<compile_context>
chip_gen: v7x
topology: tpu7x:2x2x1
jax: 0.10.0
libtpu: 0.0.40
codegen_flags: <defaults>
</compile_context>

<pallas_src>
import jax
import jax.numpy as jnp
from jax.experimental import pallas as pl
from jax.experimental.pallas import tpu as pltpu


def _convbnrelu_kernel(xm_ref, xh_ref, w_ref, shift_ref, o_ref):
    # xm_ref:    (1, TH, W+2, Cin)  main rows of the padded input strip
    # xh_ref:    (1, 2,  W+2, Cin)  2-row halo directly below the strip
    # w_ref:     (9*Cin, Cout_p)    conv weights with BN scale folded in (resident)
    # shift_ref: (1, Cout_p)        folded BN shift = beta - mean * scale   (f32)
    # o_ref:     (1, TH, W, Cout_p)
    _, TH, W, Cp = o_ref.shape
    Cin = xm_ref.shape[-1]

    # Full (TH+2, W+2, Cin) halo'd strip, assembled in VMEM.
    strip = jnp.concatenate([xm_ref[0], xh_ref[0]], axis=0)

    # In-kernel im2col: 9 static tap slices, concatenated along channels.
    # Channel order (dy, dx, ci) matches the wrapper's weight reshape.
    patches = jnp.concatenate(
        [strip[dy:dy + TH, dx:dx + W, :] for dy in range(3) for dx in range(3)],
        axis=-1)                                                   # (TH, W, 9*Cin)

    acc = jnp.dot(patches.reshape(TH * W, 9 * Cin), w_ref[...],
                  preferred_element_type=jnp.float32)              # (TH*W, Cp) f32 on MXU
    y = jnp.maximum(acc + shift_ref[...], 0.0)                     # folded BN shift + ReLU
    o_ref[0] = y.reshape(TH, W, Cp).astype(o_ref.dtype)


def convbnrelu_forward(x_nchw, weight_oihw, gamma, beta, running_mean, running_var,
                       eps=1e-5, compute_dtype=jnp.bfloat16, out_dtype=None, block_h=None):
    """Forward of convbnrelu(in_c, out_c, k=3, s=1, p=1, bias=False, bn=True, relu=True)."""
    N, Cin, H, W = x_nchw.shape
    Cout = weight_oihw.shape[0]
    K = 9 * Cin
    if out_dtype is None:
        out_dtype = x_nchw.dtype

    # ---- glue: BN folding + weight layout (tiny tensors, plain JAX) ----
    scale = (gamma / jnp.sqrt(running_var + eps)).astype(jnp.float32)    # (Cout,)
    shift = (beta - running_mean * scale).astype(jnp.float32)            # (Cout,)

    w_hwio = jnp.transpose(weight_oihw, (2, 3, 1, 0))                    # (3,3,Cin,Cout)
    w2d = w_hwio.reshape(K, Cout).astype(jnp.float32) * scale[None, :]   # fold BN scale

    # Output-channel padding to a multiple of 128 -> lane-dense stores.
    TC = 128
    Cout_p = -(-Cout // TC) * TC
    w2d = jnp.pad(w2d, ((0, 0), (0, Cout_p - Cout))).astype(compute_dtype)
    shift_p = jnp.pad(shift, (0, Cout_p - Cout)).reshape(1, Cout_p)

    # Row-strip tiling: target M = TH*W ~= 256 per matmul; TH even (2-row halo block).
    if block_h is None:
        block_h = -(-256 // W)
    TH = max(2, min(block_h, H))
    TH = TH + (TH % 2)                                 # even, so the halo block aligns
    H_pad = -(-H // TH) * TH
    n_strips = H_pad // TH
    halo_base = TH // 2

    # NHWC + conv padding (p=1) + bottom rows so H_pad divides into strips; cast fused.
    x_nhwc = jnp.transpose(x_nchw, (0, 2, 3, 1))                         # N,H,W,Cin
    x_pad = jnp.pad(x_nhwc, ((0, 0), (1, 1 + (H_pad - H)), (1, 1), (0, 0))
                    ).astype(compute_dtype)                              # (N, H_pad+2, W+2, Cin)

    grid = (N, n_strips)

    out_nhwc = pl.pallas_call(
        _convbnrelu_kernel,
        out_shape=jax.ShapeDtypeStruct((N, H_pad, W, Cout_p), out_dtype),
        grid_spec=pltpu.PrefetchScalarGridSpec(
            num_scalar_prefetch=0,
            grid=grid,
            in_specs=[
                # main rows of the strip: padded rows [h*TH, h*TH+TH)
                pl.BlockSpec((1, TH, W + 2, Cin), lambda n, h: (n, h, 0, 0)),
                # 2-row halo below: padded rows [h*TH+TH, h*TH+TH+2)  (same array, 2nd spec)
                pl.BlockSpec((1, 2, W + 2, Cin),
                             lambda n, h: (n, (h + 1) * halo_base, 0, 0)),
                # constant index_maps -> fetched once, resident in VMEM across the grid
                pl.BlockSpec((K, Cout_p), lambda n, h: (0, 0)),
                pl.BlockSpec((1, Cout_p), lambda n, h: (0, 0)),
            ],
            out_specs=pl.BlockSpec((1, TH, W, Cout_p), lambda n, h: (n, h, 0, 0)),
        ),
        compiler_params=pltpu.CompilerParams(
            dimension_semantics=("parallel", "parallel"),
            vmem_limit_bytes=48 * 1024 * 1024),
    )(x_pad, x_pad, w2d, shift_p)

    out_nhwc = out_nhwc[:, :H, :, :Cout]                                 # drop padding (glue)
    return jnp.transpose(out_nhwc, (0, 3, 1, 2))                         # back to NCHW


def _reference(x_nchw, weight_oihw, gamma, beta, running_mean, running_var, eps=1e-5):
    y = jax.lax.conv_general_dilated(
        x_nchw, weight_oihw, window_strides=(1, 1), padding=((1, 1), (1, 1)),
        dimension_numbers=("NCHW", "OIHW", "NCHW"))
    scale = gamma / jnp.sqrt(running_var + eps)
    shift = beta - running_mean * scale
    y = y * scale[None, :, None, None] + shift[None, :, None, None]
    return jnp.maximum(y, 0.0)


if __name__ == "__main__":
    key = jax.random.PRNGKey(0)
    k_x, k_w, k_g, k_b, k_m, k_v = jax.random.split(key, 6)

    N, Cin, Cout, H, W = 2, 4, 8, 16, 16

    x = jax.random.normal(k_x, (N, Cin, H, W), dtype=jnp.float32)
    weight = jax.random.normal(k_w, (Cout, Cin, 3, 3), dtype=jnp.float32) * 0.1
    gamma = 1.0 + 0.1 * jax.random.normal(k_g, (Cout,), dtype=jnp.float32)
    beta = 0.1 * jax.random.normal(k_b, (Cout,), dtype=jnp.float32)
    running_mean = 0.05 * jax.random.normal(k_m, (Cout,), dtype=jnp.float32)
    running_var = jnp.abs(1.0 + 0.1 * jax.random.normal(k_v, (Cout,), dtype=jnp.float32))

    ref = _reference(x, weight, gamma, beta, running_mean, running_var)

    # f32 path: exact check against the lax.conv reference.
    out_f32 = convbnrelu_forward(x, weight, gamma, beta, running_mean, running_var,
                                 compute_dtype=jnp.float32)
    out_f32 = jax.block_until_ready(out_f32)
    assert out_f32.shape == (N, Cout, H, W)
    assert jnp.allclose(out_f32, ref, atol=1e-4, rtol=1e-4), "f32 mismatch vs lax.conv reference"

    # bf16 MXU path (v6e/v7x): f32 accumulation, looser tolerance for bf16 input rounding.
    out_bf16 = convbnrelu_forward(x, weight, gamma, beta, running_mean, running_var,
                                  compute_dtype=jnp.bfloat16)
    out_bf16 = jax.block_until_ready(out_bf16)
    assert out_bf16.shape == (N, Cout, H, W)
    assert jnp.allclose(out_bf16, ref, atol=5e-2, rtol=5e-2), "bf16 mismatch vs lax.conv reference"

    print("KERNEL_OK")
</pallas_src>

<mosaic_0001>
module attributes {stable_mosaic.version = 11 : i64} {
  func.func @_convbnrelu_kernel(%arg0: i32, %arg1: i32, %arg2: memref<1x16x18x4xf32, #tpu.memory_space<vmem>>, %arg3: memref<1x2x18x4xf32, #tpu.memory_space<vmem>>, %arg4: memref<36x128xf32, #tpu.memory_space<vmem>>, %arg5: memref<1x128xf32, #tpu.memory_space<vmem>>, %arg6: memref<1x16x16x128xf32, #tpu.memory_space<vmem>>) attributes {dimension_semantics = [#tpu.dimension_semantics<parallel>, #tpu.dimension_semantics<parallel>], iteration_bounds = array<i64: 2, 1>, scalar_prefetch = 0 : i64, scratch_operands = 0 : i64, tpu.core_type = #tpu.core_type<tc>, window_params = [{transform_indices = @transform_0, window_bounds = array<i64: 1, 16, 18, 4>}, {transform_indices = @transform_1, window_bounds = array<i64: 1, 2, 18, 4>}, {pipeline_mode = #tpu.pipeline_mode<synchronous>, transform_indices = @transform_2, window_bounds = array<i64: 36, 128>}, {pipeline_mode = #tpu.pipeline_mode<synchronous>, transform_indices = @transform_3, window_bounds = array<i64: 1, 128>}, {transform_indices = @transform_4, window_bounds = array<i64: 1, 16, 16, 128>}]} {
    %c0 = arith.constant 0 : index
    %c0_0 = arith.constant 0 : index
    %c0_1 = arith.constant 0 : index
    %c0_2 = arith.constant 0 : index
    %0 = vector.load %arg2[%c0, %c0_0, %c0_1, %c0_2] : memref<1x16x18x4xf32, #tpu.memory_space<vmem>>, vector<1x16x18x4xf32>
    %1 = vector.shape_cast %0 : vector<1x16x18x4xf32> to vector<16x18x4xf32>
    %c0_3 = arith.constant 0 : index
    %c0_4 = arith.constant 0 : index
    %c0_5 = arith.constant 0 : index
    %c0_6 = arith.constant 0 : index
    %2 = vector.load %arg3[%c0_3, %c0_4, %c0_5, %c0_6] : memref<1x2x18x4xf32, #tpu.memory_space<vmem>>, vector<1x2x18x4xf32>
    %3 = vector.shape_cast %2 : vector<1x2x18x4xf32> to vector<2x18x4xf32>
    %4 = tpu.concatenate %1, %3 in 0 : vector<16x18x4xf32>, vector<2x18x4xf32> -> vector<18x18x4xf32>
    %5 = vector.extract_strided_slice %4 {offsets = [0, 0, 0], sizes = [16, 16, 4], strides = [1, 1, 1]} : vector<18x18x4xf32> to vector<16x16x4xf32>
    %6 = vector.extract_strided_slice %4 {offsets = [0, 1, 0], sizes = [16, 16, 4], strides = [1, 1, 1]} : vector<18x18x4xf32> to vector<16x16x4xf32>
    %7 = vector.extract_strided_slice %4 {offsets = [0, 2, 0], sizes = [16, 16, 4], strides = [1, 1, 1]} : vector<18x18x4xf32> to vector<16x16x4xf32>
    %8 = vector.extract_strided_slice %4 {offsets = [1, 0, 0], sizes = [16, 16, 4], strides = [1, 1, 1]} : vector<18x18x4xf32> to vector<16x16x4xf32>
    %9 = vector.extract_strided_slice %4 {offsets = [1, 1, 0], sizes = [16, 16, 4], strides = [1, 1, 1]} : vector<18x18x4xf32> to vector<16x16x4xf32>
    %10 = vector.extract_strided_slice %4 {offsets = [1, 2, 0], sizes = [16, 16, 4], strides = [1, 1, 1]} : vector<18x18x4xf32> to vector<16x16x4xf32>
    %11 = vector.extract_strided_slice %4 {offsets = [2, 0, 0], sizes = [16, 16, 4], strides = [1, 1, 1]} : vector<18x18x4xf32> to vector<16x16x4xf32>
    %12 = vector.extract_strided_slice %4 {offsets = [2, 1, 0], sizes = [16, 16, 4], strides = [1, 1, 1]} : vector<18x18x4xf32> to vector<16x16x4xf32>
    %13 = vector.extract_strided_slice %4 {offsets = [2, 2, 0], sizes = [16, 16, 4], strides = [1, 1, 1]} : vector<18x18x4xf32> to vector<16x16x4xf32>
    %14 = tpu.concatenate %5, %6, %7, %8, %9, %10, %11, %12, %13 in 2 : vector<16x16x4xf32>, vector<16x16x4xf32>, vector<16x16x4xf32>, vector<16x16x4xf32>, vector<16x16x4xf32>, vector<16x16x4xf32>, vector<16x16x4xf32>, vector<16x16x4xf32>, vector<16x16x4xf32> -> vector<16x16x36xf32>
    %15 = vector.shape_cast %14 : vector<16x16x36xf32> to vector<256x36xf32>
    %c0_7 = arith.constant 0 : index
    %c0_8 = arith.constant 0 : index
    %16 = vector.load %arg4[%c0_7, %c0_8] : memref<36x128xf32, #tpu.memory_space<vmem>>, vector<36x128xf32>
    %cst = arith.constant dense<0.000000e+00> : vector<256x128xf32>
    %17 = tpu.matmul %15, %16, %cst {dimension_numbers = #tpu.dot_dimension_numbers<[1], [0], [0], [1], [0, 0, 1, 1], [], []>} : vector<256x36xf32>, vector<36x128xf32>, vector<256x128xf32> -> vector<256x128xf32>
    %c0_9 = arith.constant 0 : index
    %c0_10 = arith.constant 0 : index
    %18 = vector.load %arg5[%c0_9, %c0_10] : memref<1x128xf32, #tpu.memory_space<vmem>>, vector<1x128xf32>
    %19 = vector.broadcast %18 : vector<1x128xf32> to vector<256x128xf32>
    %20 = arith.addf %17, %19 : vector<256x128xf32>
    %cst_11 = arith.constant 0.000000e+00 : f32
    %21 = vector.broadcast %cst_11 : f32 to vector<256x128xf32>
    %22 = arith.maximumf %20, %21 : vector<256x128xf32>
    %23 = vector.shape_cast %22 : vector<256x128xf32> to vector<16x16x128xf32>
    %c0_12 = arith.constant 0 : index
    %c0_13 = arith.constant 0 : index
    %c0_14 = arith.constant 0 : index
    %c0_15 = arith.constant 0 : index
    %24 = vector.load %arg6[%c0_12, %c0_13, %c0_14, %c0_15] : memref<1x16x16x128xf32, #tpu.memory_space<vmem>>, vector<1x16x16x128xf32>
    %25 = vector.shape_cast %24 : vector<1x16x16x128xf32> to vector<16x16x128xf32>
    %26 = vector.shape_cast %23 : vector<16x16x128xf32> to vector<1x16x16x128xf32>
    tpu.vector_store %arg6[%c0_12, %c0_13, %c0_14, %c0_15], %26 {strides = array<i32>} : memref<1x16x16x128xf32, #tpu.memory_space<vmem>>, vector<1x16x16x128xf32>,
    return
  }
  func.func @transform_0(%arg0: i32, %arg1: i32) -> (i32, i32, i32, i32) {
    %c0_i32 = arith.constant 0 : i32
    %c0_i32_0 = arith.constant 0 : i32
    %c0_i32_1 = arith.constant 0 : i32
    return %arg0, %arg1, %c0_i32, %c0_i32_0 : i32, i32, i32, i32
  }
  func.func @transform_1(%arg0: i32, %arg1: i32) -> (i32, i32, i32, i32) {
    %c1_i32 = arith.constant 1 : i32
    %0 = arith.addi %arg1, %c1_i32 : i32
    %c8_i32 = arith.constant 8 : i32
    %1 = arith.muli %0, %c8_i32 : i32
    %c0_i32 = arith.constant 0 : i32
    %c0_i32_0 = arith.constant 0 : i32
    %c0_i32_1 = arith.constant 0 : i32
    return %arg0, %1, %c0_i32, %c0_i32_0 : i32, i32, i32, i32
  }
  func.func @transform_2(%arg0: i32, %arg1: i32) -> (i32, i32) {
    %c0_i32 = arith.constant 0 : i32
    %c0_i32_0 = arith.constant 0 : i32
    %c0_i32_1 = arith.constant 0 : i32
    return %c0_i32, %c0_i32_0 : i32, i32
  }
  func.func @transform_3(%arg0: i32, %arg1: i32) -> (i32, i32) {
    %c0_i32 = arith.constant 0 : i32
    %c0_i32_0 = arith.constant 0 : i32
    %c0_i32_1 = arith.constant 0 : i32
    return %c0_i32, %c0_i32_0 : i32, i32
  }
  func.func @transform_4(%arg0: i32, %arg1: i32) -> (i32, i32, i32, i32) {
    %c0_i32 = arith.constant 0 : i32
    %c0_i32_0 = arith.constant 0 : i32
    %c0_i32_1 = arith.constant 0 : i32
    return %arg0, %arg1, %c0_i32, %c0_i32_0 : i32, i32, i32, i32
  }
}

</mosaic_0001>

<bundles_post_ra>
// kernel: tpu_custom_call.1
= control target key start
LH: loop header
LB: loop body
LE: loop exit
PB: predicated region body
PF: predicated region fallthrough
CT: control target
= control target key end

     0   :  { %9 = vsyncpa [#allocation3], 0  ;;  %s4389_s0 = inlined_call_operand.vmem [shape: f32[2,18,18,4], index: 0, kind: input, shape index: {}]   ;;  %s4390_s1 = inlined_call_operand.vmem [shape: f32[2,18,18,4], index: 1, kind: input, shape index: {}]   ;;  %s4391_s2 = inlined_call_operand.vmem [shape: f32[36,128], index: 2, kind: input, shape index: {}]   ;;  %s4392_s3 = inlined_call_operand.vmem [shape: f32[1,128], index: 3, kind: input, shape index: {}]   ;;  %s4393_s4 = inlined_call_operand.hbm [shape: f32[2,16,16,128], index: 4, kind: output, shape index: {}]  }
   0x1   :  { %11 = vsyncpa [#allocation3 + $0x1], 0  ;;  %s2512_s15 = smov 0   ;;  %s2514_s16 = smov 0  }
   0x2   :  { %s2516_s17 = smov 0   ;;  %s2518_s18 = smov 0  }
   0x3   :  { %s2520_s19 = smov 0   ;;  %s2522_s20 = smov 0  }
   0x4 LB: > { %s2152_s21 = sadd.s32 4294967295, %s2475_s20   ;;  %s2153_s22 = sadd.s32 4294967294, %s2475_s20   ;;  %s2475_s20 = sphi %s2522_s20, %s17_s20   ;;  %s2471_s19 = sphi %s2520_s19, %s4646_s19   ;;  %s2467_s18 = sphi %s2518_s18, %s4645_s18   ;;  %s2463_s17 = sphi %s2516_s17, %s4644_s17   ;;  %s2459_s16 = sphi %s2514_s16, %s4643_s16   ;;  %s2455_s15 = sphi %s2512_s15, %s4642_s15  }
   0x5   : > { %s29_s23 = sadd.s32 1, %s2471_s19  ;;  %s140_s24 = sadd.s32 1, %s2463_s17 }
   0x6   : > { %p31_p0 = scmp.ge.s32.totalorder %s29_s23, 2  ;;  %p150_p1 = scmp.ne.s32.totalorder %s2463_s17, %s2459_s16 }
   0x7   : > { %p151_p2 = scmp.eq.s32.totalorder %s2152_s21, 1  ;;  %p156_p3 = scmp.ne.s32.totalorder %s2459_s16, %s2455_s15 }
   0x8   : > { %s4648_s23 = smov (%p31_p0, %s29_s23), 0  ;;  %p157_p5 = scmp.eq.s32.totalorder %s2153_s22, 1 }
   0x9   : > { %p2552_p4 = por %p151_p2, %p150_p1  ;;  %s135_s26 = ssub.s32 %s2471_s19, %s4648_s23 }
   0xa   : > { %p2156_p6 = scmp.ge.s32.totalorder %s2475_s20, 1  ;;  %p138_p7 = scmp.eq.s32.totalorder %s135_s26, 0 }
   0xb   : > { %p2559_p8 = por %p157_p5, %p156_p3  ;;  %p223_p9 = scmp.lt.s32.totalorder %s2475_s20, 3 }
   0xc   : > { %s2565_s28 = scalar_select %p138_p7, %s2463_s17, %s140_s24  }
   0xd   : > { %p224_p10 = pnand %p2156_p6, %p223_p9 }
   0xf   : > { %227 = sbr.rel (%p224_p10) target bundleno = 890 (0x37a), region = 36 }
  0x16   : > { %p277_p11 = scmp.lt.s32.totalorder %s2467_s18, 1  ;;  %vm410_vm0 = vcmask 1046528   ;;  %s2477_s8 = smov 4   ;;  %vm587_vm1 = vcmask 1045504   ;;  %vm1366_vm2 = vcmask 31744   ;;  %vm1399_vm3 = vcmask 64512  }
  0x17   : > { %s2478_s9 = smov 8   ;;  %s2479_s10 = smov 12   ;;  %vm1739_vm4 = vcmask 1043456   ;;  %vm1432_vm5 = vcmask 97280   ;;  %vm1465_vm6 = vcmask 130048   ;;  %vm1498_vm7 = vcmask 162816  }
  0x18   : > { %s2569_s29 = scalar_select %p277_p11, %s2467_s18, 1  ;;  %vm1531_vm8 = vcmask 195584   ;;  %vm1564_vm9 = vcmask 228352   ;;  %vm1597_vm10 = vcmask 261120   ;;  %vm1642_vm11 = vcmask 293888  }
  0x19   : > { %s2480_s21 = smov 16   ;;  %s2481_s22 = smov 20  }
  0x1a   : > { %s2311_s30 = smul.u32 432, %s2569_s29  ;;  %s2482_s24 = smov 24  }
  0x1b   : > { %s2483_s6 = smov 28   ;;  %s2484_s29 = smov 32  }
  0x1c   : > { %s2577_s7 = scalar_lea.vmem %s4389_s0, %s2311_s30  ;;  %s2200_s11 = sadd.s32 384, %s2311_s30 }
  0x1d   : > { %v2580_v0 = vld [vmem:[%s2577_s7 + $0x18] sm:$0xff]  ;;  %v2583_v1 = vld [vmem:[%s2577_s7 + $0x20] sm:$0xff]  ;;  %v2591_v5 = vld [vmem:[%s2577_s7 + $0x8] sm:$0xff]  ;;  %s3258_s14 = scalar_lea.vmem %s4390_s1, %s2200_s11  ;;  %s2201_s30 = sshll.u32 %s2467_s18, 12 }
  0x1e   : > { %v2586_v2 = vld [vmem:[%s2577_s7] sm:$0xff]  ;;  %v416_v3 = vrot.slane %v2580_v0, 1  ;;  %v417_v4 = vrot.slane %v2583_v1, 1  ;;  %v2595_v7 = vld [vmem:[%s2577_s7 + $0x28] sm:$0x3]  ;;  %v412_v8 = vrot.slane %v2591_v5, 1 }
  0x1f   : > { %v411_v6 = vrot.slane %v2586_v2, 1  ;;  %v419_v9 = vrot.slane %v2595_v7, 1  ;;  %v2600_v10 = vld [vmem:[%s2577_s7 + $0x10] sm:$0x3]  ;;  %v2603_v11 = vld [vmem:[%s2577_s7 + $0x38] sm:$0xff]  ;;  %v2633_v24 = vld [vmem:[%s2577_s7 + $0x48] sm:$0xff] }
  0x20   : > { %v2606_v12 = vsel %vm410_vm0, %v416_v3, %v417_v4  ;;  %v414_v13 = vrot.slane %v2600_v10, 1  ;;  %v2610_v14 = vld [vmem:[%s2577_s7 + $0x40] sm:$0x3]  ;;  %v2613_v15 = vld [vmem:[%s2577_s7 + $0x30] sm:$0xff]  ;;  %v422_v18 = vrot.slane %v2603_v11, 1  ;;  %v426_v29 = vrot.slane %v2633_v24, 1 }
  0x21   : > { %495 = vrot.lane.b32.xlu1 %v2606_v12, %s2477_s8  ;;  %v413_v16 = vsel %vm410_vm0, %v411_v6, %v412_v8  ;;  %v2620_v17 = vsel %vm410_vm0, %v417_v4, %v419_v9  ;;  %v424_v19 = vrot.slane %v2610_v14, 1  ;;  %v421_v21 = vrot.slane %v2613_v15, 1  ;;  %v2627_v22 = vld [vmem:[%s2577_s7 + $0x50] sm:$0xff]  ;;  %v2630_v23 = vld [vmem:[%s2577_s7 + $0x58] sm:$0x3]  ;;  %v2648_v30 = vld [vmem:[%s2577_s7 + $0x68] sm:$0xff] }
  0x22   : > { %491 = vrot.lane.b32.xlu0 %v413_v16, %s2477_s8  ;;  %v415_v20 = vsel %vm410_vm0, %v412_v8, %v414_v13  ;;  %v427_v26 = vrot.slane %v2627_v22, 1  ;;  %v429_v27 = vrot.slane %v2630_v23, 1  ;;  %v2651_v31 = vld [vmem:[%s2577_s7 + $0x70] sm:$0x3]  ;;  %v2654_v32 = vld [vmem:[%s2577_s7 + $0x60] sm:$0xff]  ;;  %v432_v34 = vrot.slane %v2648_v30, 1 }
  0x23   : > { %v2639_v25 = vsel %vm410_vm0, %v422_v18, %v424_v19  ;;  %v2644_v28 = vsel %vm410_vm0, %v421_v21, %v422_v18  ;;  %v434_v35 = vrot.slane %v2651_v31, 1  ;;  %v431_v37 = vrot.slane %v2654_v32, 1  ;;  %v2670_v38 = vld [vmem:[%s2577_s7 + $0x80] sm:$0xff]  ;;  %v2673_v39 = vld [vmem:[%s2577_s7 + $0x88] sm:$0x3]  ;;  %v2676_v40 = vld [vmem:[%s2577_s7 + $0x78] sm:$0xff] }
  0x24   : > { %v2661_v33 = vsel %vm410_vm0, %v427_v26, %v429_v27  ;;  %v2666_v36 = vsel %vm410_vm0, %v426_v29, %v427_v26  ;;  %v437_v42 = vrot.slane %v2670_v38, 1  ;;  %v439_v43 = vrot.slane %v2673_v39, 1  ;;  %v2692_v46 = vld [vmem:[%s2577_s7 + $0x98] sm:$0xff]  ;;  %v2695_v47 = vld [vmem:[%s2577_s7 + $0xa0] sm:$0x3]  ;;  %v2698_v48 = vld [vmem:[%s2577_s7 + $0x90] sm:$0xff] }
  0x25   : > { %497 = vrot.lane.b32.xlu1 %v2620_v17, %s2477_s8  ;;  %4496 = vst [vmem:[#allocation5_spill] sm:$0xff] %v2661_v33  ;;  %4497 = vst [vmem:[#allocation6_spill] sm:$0xff] %v2666_v36  ;;  %v2683_v41 = vsel %vm410_vm0, %v432_v34, %v434_v35  ;;  %v2688_v44 = vsel %vm410_vm0, %v431_v37, %v432_v34  ;;  %v436_v45 = vrot.slane %v2676_v40, 1  ;;  %v442_v50 = vrot.slane %v2692_v46, 1  ;;  %v2714_v54 = vld [vmem:[%s2577_s7 + $0xb0] sm:$0xff]  ;;  %v2720_v56 = vld [vmem:[%s2577_s7 + $0xa8] sm:$0xff] }
  0x26   : > { %493 = vrot.lane.b32.xlu0 %v415_v20, %s2477_s8  ;;  %4498 = vst [vmem:[#allocation7_spill] sm:$0xff] %v2683_v41  ;;  %4499 = vst [vmem:[#allocation8_spill] sm:$0xff] %v2688_v44  ;;  %v2705_v49 = vsel %vm410_vm0, %v437_v42, %v439_v43  ;;  %v444_v51 = vrot.slane %v2695_v47, 1  ;;  %v441_v53 = vrot.slane %v2698_v48, 1  ;;  %v2717_v55 = vld [vmem:[%s2577_s7 + $0xb8] sm:$0x3] }
  0x27   : > { %4500 = vst [vmem:[#allocation9_spill] sm:$0xff] %v2705_v49  ;;  %v2710_v52 = vsel %vm410_vm0, %v436_v45, %v437_v42  ;;  %v447_v58 = vrot.slane %v2714_v54, 1  ;;  %v449_v59 = vrot.slane %v2717_v55, 1  ;;  %v446_v61 = vrot.slane %v2720_v56, 1  ;;  %v2736_v62 = vld [vmem:[%s2577_s7 + $0xc8] sm:$0xff]  ;;  %v2742_v3 = vld [vmem:[%s2577_s7 + $0xc0] sm:$0xff] }
  0x28   : > { %4501 = vst [vmem:[#allocation10_spill] sm:$0xff] %v2710_v52  ;;  %v2727_v57 = vsel %vm410_vm0, %v442_v50, %v444_v51  ;;  %v2732_v60 = vsel %vm410_vm0, %v441_v53, %v442_v50  ;;  %v2739_v63 = vld [vmem:[%s2577_s7 + $0xd0] sm:$0x3]  ;;  %v452_v6 = vrot.slane %v2736_v62, 1  ;;  %v451_v13 = vrot.slane %v2742_v3, 1  ;;  %v2758_v16 = vld [vmem:[%s2577_s7 + $0xe0] sm:$0xff] }
  0x29   : > { %501 = vrot.lane.b32.xlu1 %v2639_v25, %s2477_s8  ;;  %4502 = vst [vmem:[#allocation11_spill] sm:$0xff] %v2727_v57  ;;  %4503 = vst [vmem:[#allocation12_spill] sm:$0xff] %v2732_v60  ;;  %v2749_v4 = vsel %vm410_vm0, %v447_v58, %v449_v59  ;;  %v454_v8 = vrot.slane %v2739_v63, 1  ;;  %v2754_v9 = vsel %vm410_vm0, %v446_v61, %v447_v58  ;;  %v2761_v18 = vld [vmem:[%s2577_s7 + $0xe8] sm:$0x3]  ;;  %v2764_v19 = vld [vmem:[%s2577_s7 + $0xd8] sm:$0xff] }
  0x2a   : > { %499 = vrot.lane.b32.xlu0 %v2644_v28, %s2477_s8  ;;  %4504 = vst [vmem:[#allocation13_spill] sm:$0xff] %v2749_v4  ;;  %4505 = vst [vmem:[#allocation14_spill] sm:$0xff] %v2754_v9  ;;  %v457_v21 = vrot.slane %v2758_v16, 1  ;;  %v459_v26 = vrot.slane %v2761_v18, 1  ;;  %v2776_v27 = vsel %vm410_vm0, %v451_v13, %v452_v6  ;;  %v456_v29 = vrot.slane %v2764_v19, 1  ;;  %v2780_v34 = vld [vmem:[%s2577_s7 + $0xf8] sm:$0xff] }
  0x2b   : > { %v2771_v20 = vsel %vm410_vm0, %v452_v6, %v454_v8  ;;  %4507 = vst [vmem:[#allocation16_spill] sm:$0xff] %v2776_v27  ;;  %v2783_v35 = vld [vmem:[%s2577_s7 + $0x100] sm:$0x3]  ;;  %v2786_v37 = vld [vmem:[%s2577_s7 + $0xf0] sm:$0xff]  ;;  %v462_v43 = vrot.slane %v2780_v34, 1  ;;  %v2808_v59 = vld [vmem:[%s2577_s7 + $0x108] sm:$0xff] }
  0x2c   : > { %4506 = vst [vmem:[#allocation15_spill] sm:$0xff] %v2771_v20  ;;  %v2793_v42 = vsel %vm410_vm0, %v457_v21, %v459_v26  ;;  %v464_v45 = vrot.slane %v2783_v35, 1  ;;  %v2798_v50 = vsel %vm410_vm0, %v456_v29, %v457_v21  ;;  %v461_v51 = vrot.slane %v2786_v37, 1  ;;  %v2802_v53 = vld [vmem:[%s2577_s7 + $0x110] sm:$0xff]  ;;  %v2805_v58 = vld [vmem:[%s2577_s7 + $0x118] sm:$0x3] }
  0x2d   : > { %505 = vrot.lane.b32.xlu1 %v2661_v33, %s2477_s8  ;;  %4508 = vst [vmem:[#allocation17_spill] sm:$0xff] %v2793_v42  ;;  %v467_v6 = vrot.slane %v2802_v53, 1  ;;  %v469_v8 = vrot.slane %v2805_v58, 1  ;;  %v466_v21 = vrot.slane %v2808_v59, 1  ;;  %v2824_v26 = vld [vmem:[%s2577_s7 + $0x128] sm:$0xff]  ;;  %v2874_v33 = vld [vmem:[%s2577_s7 + $0x150] sm:$0xff] }
  0x2e   : > { %503 = vrot.lane.b32.xlu0 %v2666_v36, %s2477_s8  ;;  %v2815_v61 = vsel %vm410_vm0, %v462_v43, %v464_v45  ;;  %v2820_v13 = vsel %vm410_vm0, %v461_v51, %v462_v43  ;;  %v2827_v29 = vld [vmem:[%s2577_s7 + $0x130] sm:$0x3]  ;;  %v472_v43 = vrot.slane %v2824_v26, 1  ;;  %s2485_s12 = smov [#allocation2]  }
  0x2f   : > { %4509 = vst [vmem:[#allocation18_spill] sm:$0xff] %v2815_v61  ;;  %4510 = vst [vmem:[#allocation19_spill] sm:$0xff] %v2820_v13  ;;  %v2837_v45 = vsel %vm410_vm0, %v467_v6, %v469_v8  ;;  %v474_v51 = vrot.slane %v2827_v29, 1  ;;  %s2401_s13 = sshll.u32 %s2485_s12, 4  ;;  %s2402_s13 = int_to_ptr.vmem [resolvable:$false] %s2401_s13 }
  0x30   : > { %4511 = vst [vmem:[#allocation20_spill] sm:$0xff] %v2837_v45  ;;  %s2403_s26 = scalar_lea.vmem %s2402_s13, 8192 }
  0x31   : > { %509 = vrot.lane.b32.xlu1 %v2683_v41, %s2477_s8  ;;  %v2859_v8 = vsel %vm410_vm0, %v472_v43, %v474_v51  ;;  %v2868_v41 = vld [vmem:[%s2577_s7 + $0x158] sm:$0xff] }
  0x32   : > { %507 = vrot.lane.b32.xlu0 %v2688_v44, %s2477_s8  ;;  %4513 = vst [vmem:[#allocation22_spill] sm:$0xff] %v2859_v8  ;;  %v2871_v44 = vld [vmem:[%s2577_s7 + $0x160] sm:$0x3] }
  0x35   : > { %513 = vrot.lane.b32.xlu1 %v2705_v49, %s2477_s8 }
  0x36   : > { %511 = vrot.lane.b32.xlu0 %v2710_v52, %s2477_s8 }
  0x39   : > { %517 = vrot.lane.b32.xlu1 %v2727_v57, %s2477_s8  ;;  %v2849_v57 = vld [vmem:[%s2577_s7 + $0x148] sm:$0x3] }
  0x3a   : > { %515 = vrot.lane.b32.xlu0 %v2732_v60, %s2477_s8  ;;  %v2852_v60 = vld [vmem:[%s2577_s7 + $0x138] sm:$0xff] }
  0x3b   : > { %v476_v52 = vrot.slane %v2852_v60, 1 }
  0x3d   : > { %521 = vrot.lane.b32.xlu1 %v2749_v4, %s2477_s8 }
  0x3e   : > { %519 = vrot.lane.b32.xlu0 %v2754_v9, %s2477_s8  ;;  %v2846_v9 = vld [vmem:[%s2577_s7 + $0x140] sm:$0xff] }
  0x41   : > { %525 = vrot.lane.b32.xlu1 %v2771_v20, %s2477_s8  ;;  %v2830_v20 = vld [vmem:[%s2577_s7 + $0x120] sm:$0xff] }
  0x42   : > { %523 = vrot.lane.b32.xlu0 %v2776_v27, %s2477_s8  ;;  %v2842_v27 = vsel %vm410_vm0, %v466_v21, %v467_v6  ;;  %v471_v4 = vrot.slane %v2830_v20, 1  ;;  %v477_v6 = vrot.slane %v2846_v9, 1  ;;  %v479_v21 = vrot.slane %v2849_v57, 1 }
  0x43   : > { %4512 = vst [vmem:[#allocation21_spill] sm:$0xff] %v2842_v27 }
  0x44   : > { %v2864_v49 = vsel %vm410_vm0, %v471_v4, %v472_v43  ;;  %v2881_v51 = vsel %vm410_vm0, %v477_v6, %v479_v21  ;;  %v482_v4 = vrot.slane %v2868_v41, 1  ;;  %v484_v43 = vrot.slane %v2871_v44, 1 }
  0x45   : > { %529 = vrot.lane.b32.xlu1 %v2793_v42, %s2477_s8  ;;  %4514 = vst [vmem:[#allocation23_spill] sm:$0xff] %v2864_v49  ;;  %4515 = vst [vmem:[#allocation24_spill] sm:$0xff] %v2881_v51 }
  0x46   : > { %527 = vrot.lane.b32.xlu0 %v2798_v50, %s2477_s8  ;;  %v2903_v21 = vsel %vm410_vm0, %v482_v4, %v484_v43  ;;  %v589_v43 = vrot.slane %v2591_v5, 2  ;;  %v596_v5 = vrot.slane %v2595_v7, 2  ;;  %v598_v7 = vrot.slane %v2613_v15, 2 }
  0x47   : > { %4519 = vst [vmem:[#allocation28_spill] sm:$0xff] %v2903_v21 }
  0x49   : > { %533 = vrot.lane.b32.xlu1 %v2815_v61, %s2477_s8  ;;  %v2890_v61 = vld [vmem:[%s2577_s7 + $0x170] sm:$0xff] }
  0x4a   : > { %531 = vrot.lane.b32.xlu0 %v2820_v13, %s2477_s8  ;;  %4517 = vst [vmem:[#allocation26_spill] sm:$0xff] %v2890_v61  ;;  %v2893_v13 = vld [vmem:[%s2577_s7 + $0x178] sm:$0x3] }
  0x4d   : > { %537 = vrot.lane.b32.xlu1 %v2837_v45, %s2477_s8  ;;  %v2886_v45 = vsel %vm410_vm0, %v476_v52, %v477_v6  ;;  %v487_v52 = vrot.slane %v2890_v61, 1  ;;  %v489_v6 = vrot.slane %v2893_v13, 1 }
  0x4e   : > { %535 = vrot.lane.b32.xlu0 %v2842_v27, %s2477_s8  ;;  %4516 = vst [vmem:[#allocation25_spill] sm:$0xff] %v2886_v45  ;;  %v481_v27 = vrot.slane %v2874_v33, 1 }
  0x51   : > { %541 = vrot.lane.b32.xlu1 %v2859_v8, %s2477_s8  ;;  %v2896_v8 = vld [vmem:[%s2577_s7 + $0x168] sm:$0xff] }
  0x52   : > { %539 = vrot.lane.b32.xlu0 %v2864_v49, %s2477_s8  ;;  %4518 = vst [vmem:[#allocation27_spill] sm:$0xff] %v2896_v8  ;;  %v2908_v49 = vsel %vm410_vm0, %v481_v27, %v482_v4  ;;  %v486_v42 = vrot.slane %v2896_v8, 1  ;;  %v588_v27 = vrot.slane %v2586_v2, 2 }
  0x53   : > { %4520 = vst [vmem:[#allocation29_spill] sm:$0xff] %v2908_v49 }
  0x54   : > { %v2921_v36 = vsel %vm410_vm0, %v486_v42, %v487_v52  ;;  %v593_v42 = vrot.slane %v2580_v0, 2 }
  0x55   : > { %545 = vrot.lane.b32.xlu1 %v2881_v51, %s2477_s8  ;;  %v2916_v51 = vsel %vm410_vm0, %v487_v52, %v489_v6  ;;  %4522 = vst [vmem:[#allocation31_spill] sm:$0xff] %v2921_v36  ;;  %v594_v6 = vrot.slane %v2583_v1, 2  ;;  %v599_v52 = vrot.slane %v2603_v11, 2 }
  0x56   : > { %543 = vrot.lane.b32.xlu0 %v2886_v45, %s2477_s8  ;;  %4521 = vst [vmem:[#allocation30_spill] sm:$0xff] %v2916_v51  ;;  %v591_v45 = vrot.slane %v2600_v10, 2  ;;  %v590_v10 = vsel %vm587_vm1, %v588_v27, %v589_v43  ;;  %v604_v27 = vrot.slane %v2627_v22, 2 }
  0x57   : > { %v2936_v2 = vsel %vm587_vm1, %v594_v6, %v596_v5 }
  0x58   : > { %v592_v4 = vsel %vm587_vm1, %v589_v43, %v591_v45  ;;  %v601_v45 = vrot.slane %v2610_v14, 2  ;;  %v2954_v14 = vsel %vm587_vm1, %v598_v7, %v599_v52  ;;  %v614_v7 = vrot.slane %v2670_v38, 2 }
  0x59   : > { %549 = vrot.lane.b32.xlu1 %v2903_v21, %s2477_s8  ;;  %v626_v21 = vrot.slane %v2717_v55, 2 }
  0x5a   : > { %547 = vrot.lane.b32.xlu0 %v2908_v49, %s2477_s8  ;;  %v2949_v43 = vsel %vm587_vm1, %v599_v52, %v601_v45  ;;  %v608_v52 = vrot.slane %v2654_v32, 2  ;;  %v631_v49 = vrot.slane %v2739_v63, 2 }
  0x5b   : > { %4523 = vst [vmem:[#allocation32_spill] sm:$0xff] %v2949_v43 }
  0x5d   : > { %553 = vrot.lane.b32.xlu1 %v2916_v51, %s2477_s8  ;;  %v2941_v51 = vsel %vm587_vm1, %v593_v42, %v594_v6  ;;  %v603_v6 = vrot.slane %v2633_v24, 2  ;;  %v611_v42 = vrot.slane %v2651_v31, 2 }
  0x5e   : > { %551 = vrot.lane.b32.xlu0 %v2921_v36, %s2477_s8  ;;  %v621_v36 = vrot.slane %v2695_v47, 2 }
  0x61   : > { %670 = vrot.lane.b32.xlu1 %v592_v4, %s2478_s9  ;;  %v606_v4 = vrot.slane %v2630_v23, 2  ;;  %v2967_v23 = vsel %vm587_vm1, %v603_v6, %v604_v27 }
  0x62   : > { %668 = vrot.lane.b32.xlu0 %v590_v10, %s2478_s9  ;;  %v609_v10 = vrot.slane %v2648_v30, 2  ;;  %4525 = vst [vmem:[#allocation34_spill] sm:$0xff] %v2967_v23 }
  0x63   : > { %v2962_v5 = vsel %vm587_vm1, %v604_v27, %v606_v4  ;;  %v616_v4 = vrot.slane %v2673_v39, 2  ;;  %v613_v27 = vrot.slane %v2676_v40, 2 }
  0x64   : > { %4524 = vst [vmem:[#allocation33_spill] sm:$0xff] %v2962_v5  ;;  %v2975_v45 = vsel %vm587_vm1, %v609_v10, %v611_v42  ;;  %v2980_v31 = vsel %vm587_vm1, %v608_v52, %v609_v10  ;;  %v619_v42 = vrot.slane %v2692_v46, 2  ;;  %v618_v10 = vrot.slane %v2698_v48, 2 }
  0x65   : > { %674 = vrot.lane.b32.xlu1 %v2936_v2, %s2478_s9  ;;  %4526 = vst [vmem:[#allocation35_spill] sm:$0xff] %v2975_v45  ;;  %4527 = vst [vmem:[#allocation36_spill] sm:$0xff] %v2980_v31  ;;  %v2988_v6 = vsel %vm587_vm1, %v614_v7, %v616_v4  ;;  %v2993_v39 = vsel %vm587_vm1, %v613_v27, %v614_v7  ;;  %v624_v4 = vrot.slane %v2714_v54, 2  ;;  %v623_v7 = vrot.slane %v2720_v56, 2 }
  0x66   : > { %672 = vrot.lane.b32.xlu0 %v2941_v51, %s2478_s9  ;;  %4528 = vst [vmem:[#allocation37_spill] sm:$0xff] %v2988_v6  ;;  %4529 = vst [vmem:[#allocation38_spill] sm:$0xff] %v2993_v39  ;;  %v3001_v52 = vsel %vm587_vm1, %v619_v42, %v621_v36  ;;  %v3006_v47 = vsel %vm587_vm1, %v618_v10, %v619_v42  ;;  %v629_v36 = vrot.slane %v2736_v62, 2  ;;  %v628_v42 = vrot.slane %v2742_v3, 2 }
  0x67   : > { %4530 = vst [vmem:[#allocation39_spill] sm:$0xff] %v3001_v52  ;;  %4531 = vst [vmem:[#allocation40_spill] sm:$0xff] %v3006_v47  ;;  %v3014_v27 = vsel %vm587_vm1, %v624_v4, %v626_v21  ;;  %v3019_v55 = vsel %vm587_vm1, %v623_v7, %v624_v4  ;;  %v634_v21 = vrot.slane %v2758_v16, 2  ;;  %v633_v4 = vrot.slane %v2764_v19, 2 }
  0x68   : > { %4532 = vst [vmem:[#allocation41_spill] sm:$0xff] %v3014_v27  ;;  %4533 = vst [vmem:[#allocation42_spill] sm:$0xff] %v3019_v55  ;;  %v3027_v10 = vsel %vm587_vm1, %v629_v36, %v631_v49  ;;  %v3032_v63 = vsel %vm587_vm1, %v628_v42, %v629_v36  ;;  %v639_v49 = vrot.slane %v2780_v34, 2  ;;  %v638_v36 = vrot.slane %v2786_v37, 2 }
  0x69   : > { %678 = vrot.lane.b32.xlu1 %v2949_v43, %s2478_s9  ;;  %4534 = vst [vmem:[#allocation43_spill] sm:$0xff] %v3027_v10  ;;  %4535 = vst [vmem:[#allocation44_spill] sm:$0xff] %v3032_v63  ;;  %v3273_v43 = vld [vmem:[%s3258_s14] sm:$0xff] }
  0x6a   : > { %676 = vrot.lane.b32.xlu0 %v2954_v14, %s2478_s9 }
  0x6d   : > { %682 = vrot.lane.b32.xlu1 %v2962_v5, %s2478_s9 }
  0x6e   : > { %680 = vrot.lane.b32.xlu0 %v2967_v23, %s2478_s9 }
  0x71   : > { %686 = vrot.lane.b32.xlu1 %v2975_v45, %s2478_s9 }
  0x72   : > { %684 = vrot.lane.b32.xlu0 %v2980_v31, %s2478_s9 }
  0x75   : > { %690 = vrot.lane.b32.xlu1 %v2988_v6, %s2478_s9 }
  0x76   : > { %688 = vrot.lane.b32.xlu0 %v2993_v39, %s2478_s9 }
  0x79   : > { %694 = vrot.lane.b32.xlu1 %v3001_v52, %s2478_s9  ;;  %v636_v52 = vrot.slane %v2761_v18, 2  ;;  %v3045_v18 = vsel %vm587_vm1, %v633_v4, %v634_v21 }
  0x7a   : > { %692 = vrot.lane.b32.xlu0 %v3006_v47, %s2478_s9  ;;  %v661_v47 = vrot.slane %v2871_v44, 2  ;;  %v664_v44 = vrot.slane %v2890_v61, 2 }
  0x7b   : > { %v3040_v7 = vsel %vm587_vm1, %v634_v21, %v636_v52  ;;  %v644_v52 = vrot.slane %v2802_v53, 2  ;;  %v643_v21 = vrot.slane %v2808_v59, 2 }
  0x7d   : > { %698 = vrot.lane.b32.xlu1 %v3014_v27, %s2478_s9  ;;  %v641_v27 = vrot.slane %v2783_v35, 2  ;;  %v3058_v35 = vsel %vm587_vm1, %v638_v36, %v639_v49 }
  0x7e   : > { %696 = vrot.lane.b32.xlu0 %v3019_v55, %s2478_s9  ;;  %v656_v55 = vrot.slane %v2849_v57, 2 }
  0x7f   : > { %v3053_v42 = vsel %vm587_vm1, %v639_v49, %v641_v27  ;;  %v649_v27 = vrot.slane %v2824_v26, 2  ;;  %v648_v49 = vrot.slane %v2830_v20, 2 }
  0x80   : > { %4536 = vst [vmem:[#allocation45_spill] sm:$0xff] %v3053_v42 }
  0x81   : > { %702 = vrot.lane.b32.xlu1 %v3027_v10, %s2478_s9  ;;  %v646_v10 = vrot.slane %v2805_v58, 2  ;;  %v3071_v58 = vsel %vm587_vm1, %v643_v21, %v644_v52 }
  0x82   : > { %700 = vrot.lane.b32.xlu0 %v3032_v63, %s2478_s9  ;;  %v651_v63 = vrot.slane %v2827_v29, 2  ;;  %4538 = vst [vmem:[#allocation47_spill] sm:$0xff] %v3071_v58  ;;  %v3084_v29 = vsel %vm587_vm1, %v648_v49, %v649_v27 }
  0x83   : > { %v3066_v4 = vsel %vm587_vm1, %v644_v52, %v646_v10  ;;  %v654_v10 = vrot.slane %v2846_v9, 2  ;;  %4540 = vst [vmem:[#allocation49_spill] sm:$0xff] %v3084_v29  ;;  %v653_v52 = vrot.slane %v2852_v60, 2 }
  0x84   : > { %4537 = vst [vmem:[#allocation46_spill] sm:$0xff] %v3066_v4  ;;  %v3079_v36 = vsel %vm587_vm1, %v649_v27, %v651_v63  ;;  %v659_v63 = vrot.slane %v2868_v41, 2  ;;  %v658_v27 = vrot.slane %v2874_v33, 2 }
  0x85   : > { %706 = vrot.lane.b32.xlu1 %v3040_v7, %s2478_s9  ;;  %4539 = vst [vmem:[#allocation48_spill] sm:$0xff] %v3079_v36  ;;  %v3092_v21 = vsel %vm587_vm1, %v654_v10, %v656_v55  ;;  %v3099_v57 = vsel %vm587_vm1, %v653_v52, %v654_v10  ;;  %v663_v52 = vrot.slane %v2896_v8, 2 }
  0x86   : > { %704 = vrot.lane.b32.xlu0 %v3045_v18, %s2478_s9  ;;  %4541 = vst [vmem:[#allocation50_spill] sm:$0xff] %v3092_v21  ;;  %4543 = vst [vmem:[#allocation52_spill] sm:$0xff] %v3099_v57  ;;  %v3109_v55 = vsel %vm587_vm1, %v659_v63, %v661_v47  ;;  %v3116_v10 = vsel %vm587_vm1, %v658_v27, %v659_v63 }
  0x87   : > { %4545 = vst [vmem:[#allocation54_spill] sm:$0xff] %v3109_v55  ;;  %4547 = vst [vmem:[#allocation56_spill] sm:$0xff] %v3116_v10 }
  0x89   : > { %710 = vrot.lane.b32.xlu1 %v3053_v42, %s2478_s9 }
  0x8a   : > { %708 = vrot.lane.b32.xlu0 %v3058_v35, %s2478_s9 }
  0x8d   : > { %714 = vrot.lane.b32.xlu1 %v3066_v4, %s2478_s9 }
  0x8e   : > { %712 = vrot.lane.b32.xlu0 %v3071_v58, %s2478_s9 }
  0x91   : > { %718 = vrot.lane.b32.xlu1 %v3079_v36, %s2478_s9 }
  0x92   : > { %716 = vrot.lane.b32.xlu0 %v3084_v29, %s2478_s9 }
  0x93   : > { %v3096_v6 = vpop.permute.xlu1 %495 }
  0x94   : > { %4542 = vst [vmem:[#allocation51_spill] sm:$0xff] %v3096_v6  ;;  %v3102_v49 = vpop.permute.xlu0 %491  ;;  %v666_v6 = vrot.slane %v2893_v13, 2  ;;  %v3131_v13 = vsel %vm587_vm1, %v663_v52, %v664_v44 }
  0x95   : > { %4544 = vst [vmem:[#allocation53_spill] sm:$0xff] %v3102_v49  ;;  %722 = vrot.lane.b32.xlu1 %v3092_v21, %s2478_s9  ;;  %4550 = vst [vmem:[#allocation59_spill] sm:$0xff] %v3131_v13 }
  0x96   : > { %720 = vrot.lane.b32.xlu0 %v3099_v57, %s2478_s9  ;;  %v3126_v47 = vsel %vm587_vm1, %v664_v44, %v666_v6 }
  0x97   : > { %v3113_v39 = vpop.permute.xlu1 %497  ;;  %4549 = vst [vmem:[#allocation58_spill] sm:$0xff] %v3126_v47 }
  0x98   : > { %4546 = vst [vmem:[#allocation55_spill] sm:$0xff] %v3113_v39  ;;  %v3119_v49 = vpop.permute.xlu0 %493 }
  0x99   : > { %4548 = vst [vmem:[#allocation57_spill] sm:$0xff] %v3119_v49  ;;  %726 = vrot.lane.b32.xlu1 %v3109_v55, %s2478_s9 }
  0x9a   : > { %724 = vrot.lane.b32.xlu0 %v3116_v10, %s2478_s9 }
  0x9b   : > { %v3128_v21 = vpop.permute.xlu1 %501 }
  0x9c   : > { %v3133_v63 = vpop.permute.xlu0 %499 }
  0x9d   : > { %730 = vrot.lane.b32.xlu1 %v3126_v47, %s2478_s9 }
  0x9e   : > { %728 = vrot.lane.b32.xlu0 %v3131_v13, %s2478_s9 }
  0x9f   : > { %v3139_v27 = vpop.permute.xlu1 %505 }
  0xa0   : > { %v3141_v55 = vpop.permute.xlu0 %503 }
  0xa1   : > { %768 = vrot.lane.b32.xlu1 %v2583_v1, %s2479_s10 }
  0xa2   : > { %766 = vrot.lane.b32.xlu0 %v2580_v0, %s2479_s10 }
  0xa3   : > { %v3147_v6 = vpop.permute.xlu1 %509 }
  0xa4   : > { %v3149_v44 = vpop.permute.xlu0 %507 }
  0xa5   : > { %772 = vrot.lane.b32.xlu1 %v2603_v11, %s2479_s10 }
  0xa6   : > { %770 = vrot.lane.b32.xlu0 %v2613_v15, %s2479_s10 }
  0xa7   : > { %v3155_v52 = vpop.permute.xlu1 %513 }
  0xa8   : > { %v3157_v47 = vpop.permute.xlu0 %511 }
  0xa9   : > { %776 = vrot.lane.b32.xlu1 %v2627_v22, %s2479_s10 }
  0xaa   : > { %774 = vrot.lane.b32.xlu0 %v2633_v24, %s2479_s10 }
  0xab   : > { %v3163_v0 = vpop.permute.xlu1 %517 }
  0xac   : > { %v3165_v1 = vpop.permute.xlu0 %515 }
  0xad   : > { %780 = vrot.lane.b32.xlu1 %v2648_v30, %s2479_s10 }
  0xae   : > { %778 = vrot.lane.b32.xlu0 %v2654_v32, %s2479_s10 }
  0xaf   : > { %v3171_v13 = vpop.permute.xlu1 %521 }
  0xb0   : > { %v3173_v39 = vpop.permute.xlu0 %519 }
  0xb1   : > { %784 = vrot.lane.b32.xlu1 %v2670_v38, %s2479_s10 }
  0xb2   : > { %782 = vrot.lane.b32.xlu0 %v2676_v40, %s2479_s10 }
  0xb3   : > { %v3179_v10 = vpop.permute.xlu1 %525 }
  0xb4   : > { %4551 = vst [vmem:[#allocation60_spill] sm:$0xff] %v3179_v10  ;;  %v3181_v57 = vpop.permute.xlu0 %523 }
  0xb5   : > { %4552 = vst [vmem:[#allocation61_spill] sm:$0xff] %v3181_v57  ;;  %788 = vrot.lane.b32.xlu1 %v2692_v46, %s2479_s10 }
  0xb6   : > { %786 = vrot.lane.b32.xlu0 %v2698_v48, %s2479_s10 }
  0xb7   : > { %v3187_v49 = vpop.permute.xlu1 %529 }
  0xb8   : > { %4553 = vst [vmem:[#allocation62_spill] sm:$0xff] %v3187_v49  ;;  %v3189_v45 = vpop.permute.xlu0 %527 }
  0xb9   : > { %4554 = vst [vmem:[#allocation63_spill] sm:$0xff] %v3189_v45  ;;  %792 = vrot.lane.b32.xlu1 %v2714_v54, %s2479_s10 }
  0xba   : > { %790 = vrot.lane.b32.xlu0 %v2720_v56, %s2479_s10 }
  0xbb   : > { %v3195_v36 = vpop.permute.xlu1 %533 }
  0xbc   : > { %v3197_v10 = vpop.permute.xlu0 %531 }
  0xbd   : > { %796 = vrot.lane.b32.xlu1 %v2736_v62, %s2479_s10 }
  0xbe   : > { %794 = vrot.lane.b32.xlu0 %v2742_v3, %s2479_s10 }
  0xbf   : > { %v3203_v57 = vpop.permute.xlu1 %537 }
  0xc0   : > { %v3205_v49 = vpop.permute.xlu0 %535 }
  0xc1   : > { %800 = vrot.lane.b32.xlu1 %v2758_v16, %s2479_s10 }
  0xc2   : > { %798 = vrot.lane.b32.xlu0 %v2764_v19, %s2479_s10 }
  0xc3   : > { %v3211_v45 = vpop.permute.xlu1 %541 }
  0xc4   : > { %v3213_v31 = vpop.permute.xlu0 %539 }
  0xc5   : > { %804 = vrot.lane.b32.xlu1 %v2780_v34, %s2479_s10 }
  0xc6   : > { %802 = vrot.lane.b32.xlu0 %v2786_v37, %s2479_s10 }
  0xc7   : > { %v3219_v62 = vpop.permute.xlu1 %545 }
  0xc8   : > { %v3221_v3 = vpop.permute.xlu0 %543 }
  0xc9   : > { %808 = vrot.lane.b32.xlu1 %v2802_v53, %s2479_s10 }
  0xca   : > { %806 = vrot.lane.b32.xlu0 %v2808_v59, %s2479_s10 }
  0xcb   : > { %v3227_v16 = vpop.permute.xlu1 %549 }
  0xcc   : > { %v3229_v19 = vpop.permute.xlu0 %547 }
  0xcd   : > { %812 = vrot.lane.b32.xlu1 %v2824_v26, %s2479_s10 }
  0xce   : > { %810 = vrot.lane.b32.xlu0 %v2830_v20, %s2479_s10 }
  0xcf   : > { %v3235_v29 = vpop.permute.xlu1 %553 }
  0xd0   : > { %4555 = vst [vmem:[#allocation64_spill] sm:$0xff] %v3235_v29  ;;  %v3237_v5 = vpop.permute.xlu0 %551 }
  0xd1   : > { %4556 = vst [vmem:[#allocation65_spill] sm:$0xff] %v3237_v5  ;;  %816 = vrot.lane.b32.xlu1 %v2846_v9, %s2479_s10 }
  0xd2   : > { %814 = vrot.lane.b32.xlu0 %v2852_v60, %s2479_s10 }
  0xd3   : > { %v3243_v4 = vpop.permute.xlu1 %670 }
  0xd4   : > { %4557 = vst [vmem:[#allocation66_spill] sm:$0xff] %v3243_v4  ;;  %v3245_v23 = vpop.permute.xlu0 %668 }
  0xd5   : > { %4558 = vst [vmem:[#allocation67_spill] sm:$0xff] %v3245_v23  ;;  %820 = vrot.lane.b32.xlu1 %v2868_v41, %s2479_s10  ;;  %v3267_v23 = vld [vmem:[%s3258_s14 + $0x8] sm:$0xff] }
  0xd6   : > { %818 = vrot.lane.b32.xlu0 %v2874_v33, %s2479_s10 }
  0xd7   : > { %v3253_v58 = vpop.permute.xlu1 %674 }
  0xd8   : > { %4559 = vst [vmem:[#allocation68_spill] sm:$0xff] %v3253_v58  ;;  %v3260_v4 = vpop.permute.xlu0 %672  ;;  %v1372_v58 = vsel %vm1366_vm2, %v2603_v11, %v3128_v21  ;;  %v1374_v21 = vsel %vm1366_vm2, %v2627_v22, %v3139_v27 }
  0xd9   : > { %4560 = vst [vmem:[#allocation69_spill] sm:$0xff] %v3260_v4  ;;  %824 = vrot.lane.b32.xlu1 %v2890_v61, %s2479_s10  ;;  %v1371_v4 = vsel %vm1366_vm2, %v2613_v15, %v3133_v63  ;;  %v1376_v63 = vsel %vm1366_vm2, %v2648_v30, %v3147_v6  ;;  %v1377_v30 = vsel %vm1366_vm2, %v2676_v40, %v3157_v47 }
  0xda   : > { %822 = vrot.lane.b32.xlu0 %v2896_v8, %s2479_s10  ;;  %v1379_v40 = vsel %vm1366_vm2, %v2698_v48, %v3165_v1  ;;  %v1381_v48 = vsel %vm1366_vm2, %v2720_v56, %v3173_v39 }
  0xdb   : > { %v679_v42 = vpop.permute.xlu1 %678 }
  0xdc   : > { %v3279_v5 = vsel %vm1399_vm3, %v1372_v58, %v679_v42  ;;  %v677_v61 = vpop.permute.xlu0 %676  ;;  %v1373_v42 = vsel %vm1366_vm2, %v2633_v24, %v3141_v55 }
  0xdd   : > { %v3282_v8 = vsel %vm1399_vm3, %v1371_v4, %v677_v61  ;;  %828 = vrot.lane.b32.xlu1 %v3267_v23, %s2479_s10 }
  0xde   : > { %826 = vrot.lane.b32.xlu0 %v3273_v43, %s2479_s10  ;;  %s4332_s10 = scalar_lea.hbm %s4393_s4, %s2201_s30 }
  0xdf   : > { %v683_v29 = vpop.permute.xlu1 %682 }
  0xe0   : > { %v3295_v58 = vsel %vm1399_vm3, %v1374_v21, %v683_v29  ;;  %v681_v61 = vpop.permute.xlu0 %680  ;;  %v1375_v29 = vsel %vm1366_vm2, %v2654_v32, %v3149_v44 }
  0xe1   : > { %v3298_v4 = vsel %vm1399_vm3, %v1373_v42, %v681_v61  ;;  %870 = vrot.lane.b32.xlu1 %v2620_v17, %s2480_s21 }
  0xe2   : > { %868 = vrot.lane.b32.xlu0 %v2606_v12, %s2480_s21  ;;  %v1378_v12 = vsel %vm1366_vm2, %v2670_v38, %v3155_v52  ;;  %v1380_v38 = vsel %vm1366_vm2, %v2692_v46, %v3163_v0  ;;  %v1382_v46 = vsel %vm1366_vm2, %v2714_v54, %v3171_v13  ;;  %v1631_v13 = vld [vmem:[%s4391_s2 + $0x8] sm:$0xff] }
  0xe3   : > { %v687_v27 = vpop.permute.xlu1 %686 }
  0xe4   : > { %v3311_v55 = vsel %vm1399_vm3, %v1376_v63, %v687_v27  ;;  %v685_v21 = vpop.permute.xlu0 %684  ;;  %v4561_v63 = vld [vmem:[#allocation6_spill] sm:$0xff] }
  0xe5   : > { %v3314_v42 = vsel %vm1399_vm3, %v1375_v29, %v685_v21  ;;  %874 = vrot.lane.b32.xlu1 %v2639_v25, %s2480_s21  ;;  %v4562_v21 = vld [vmem:[#allocation17_spill] sm:$0xff] }
  0xe6   : > { %872 = vrot.lane.b32.xlu0 %v2644_v28, %s2480_s21 }
  0xe7   : > { %v691_v17 = vpop.permute.xlu1 %690 }
  0xe8   : > { %v3327_v6 = vsel %vm1399_vm3, %v1378_v12, %v691_v17  ;;  %v689_v44 = vpop.permute.xlu0 %688 }
  0xe9   : > { %v3330_v61 = vsel %vm1399_vm3, %v1377_v30, %v689_v44  ;;  %900 = vrot.lane.b32.xlu1 %v2798_v50, %s2480_s21  ;;  %v1388_v30 = vsel %vm1366_vm2, %v2780_v34, %v3195_v36  ;;  %v1632_v36 = vld [vmem:[%s4391_s2 + $0x10] sm:$0xff] }
  0xea   : > { %876 = vrot.lane.b32.xlu0 %v4561_v63, %s2480_s21 }
  0xeb   : > { %v695_v52 = vpop.permute.xlu1 %694 }
  0xec   : > { %v3343_v47 = vsel %vm1399_vm3, %v1380_v38, %v695_v52  ;;  %v693_v27 = vpop.permute.xlu0 %692 }
  0xed   : > { %v3346_v29 = vsel %vm1399_vm3, %v1379_v40, %v693_v27  ;;  %969 = vrot.lane.b32.xlu1 %v2941_v51, %s2481_s22  ;;  %v1390_v27 = vsel %vm1366_vm2, %v2802_v53, %v3203_v57  ;;  %v1634_v57 = vld [vmem:[%s4391_s2 + $0x20] sm:$0xf] }
  0xee   : > { %902 = vrot.lane.b32.xlu0 %v4562_v21, %s2480_s21 }
  0xef   : > { %v699_v0 = vpop.permute.xlu1 %698 }
  0xf0   : > { %v3359_v1 = vsel %vm1399_vm3, %v1382_v46, %v699_v0  ;;  %v697_v12 = vpop.permute.xlu0 %696 }
  0xf1   : > { %v3362_v17 = vsel %vm1399_vm3, %v1381_v48, %v697_v12  ;;  %971 = vrot.lane.b32.xlu1 %v2936_v2, %s2481_s22  ;;  %v1630_v2 = vld [vmem:[%s4391_s2] sm:$0xff] }
  0xf2   : > { %1001 = vrot.lane.b32.xlu0 %v3045_v18, %s2481_s22 }
  0xf3   : > { %v3368_v51 = vpop.permute.xlu1 %702 }
  0xf4   : > { %v3370_v54 = vpop.permute.xlu0 %700 }
  0xf5   : > { %1067 = vrot.lane.b32.xlu1 %v2613_v15, %s2482_s24  ;;  %v2297_v15 = vpack.c.bf16 %v1631_v13, %v1630_v2  ;;  %v1391_v13 = vsel %vm1366_vm2, %v2830_v20, %v3213_v31 }
  0xf6   : > { %1003 = vrot.lane.b32.xlu0 %v3040_v7, %s2481_s22 }
  0xf7   : > { %v3376_v56 = vpop.permute.xlu1 %706  ;;  %2298 = vmatprep.subr.bf16.mxu0 %v2297_v15  ;;  %2305 = vmatprep.subr.bf16.mxu1 %v2297_v15 }
  0xf8   : > { %v3378_v39 = vpop.permute.xlu0 %704  ;;  %2300 = vmatpush3.bf16.msra.mxu0 %v2297_v15  ;;  %2308 = vmatpush3.bf16.msra.mxu1 %v2297_v15 }
  0xf9   : > { %1069 = vrot.lane.b32.xlu1 %v2603_v11, %s2482_s24  ;;  %v1387_v11 = vsel %vm1366_vm2, %v2786_v37, %v3197_v10 }
  0xfa   : > { %1099 = vrot.lane.b32.xlu0 %v2786_v37, %s2482_s24  ;;  %v1633_v37 = vld [vmem:[%s4391_s2 + $0x18] sm:$0xff] }
  0xfb   : > { %v711_v44 = vpop.permute.xlu1 %710  ;;  %v2301_v10 = vpack.c.bf16 %v1633_v37, %v1632_v36 }
  0xfc   : > { %v3397_v38 = vsel %vm1399_vm3, %v1388_v30, %v711_v44  ;;  %v709_v52 = vpop.permute.xlu0 %708 }
  0xfd   : > { %v3400_v40 = vsel %vm1399_vm3, %v1387_v11, %v709_v52  ;;  %1169 = vrot.lane.b32.xlu1 %v2644_v28, %s2483_s6  ;;  %v1389_v28 = vsel %vm1366_vm2, %v2808_v59, %v3205_v49  ;;  %2302 = vmatprep.subr.bf16.mxu0 %v2301_v10  ;;  %v1392_v49 = vsel %vm1366_vm2, %v2824_v26, %v3211_v45  ;;  %v4564_v11 = vld [vmem:[#allocation18_spill] sm:$0xff] }
  0xfe   : > { %1101 = vrot.lane.b32.xlu0 %v2780_v34, %s2482_s24  ;;  %2306 = vmatprep.subr.bf16.mxu1 %v2301_v10  ;;  %v4563_v34 = vld [vmem:[#allocation19_spill] sm:$0xff]  ;;  %v1394_v45 = vsel %vm1366_vm2, %v2846_v9, %v3219_v62  ;;  %v1393_v52 = vsel %vm1366_vm2, %v2852_v60, %v3221_v3  ;;  %v1395_v3 = vsel %vm1366_vm2, %v2874_v33, %v3229_v19 }
  0xff   : > { %v715_v46 = vpop.permute.xlu1 %714  ;;  %2304 = vmatpush3.bf16.msra.mxu0 %v2301_v10  ;;  %2309 = vmatpush3.bf16.msra.mxu1 %v2301_v10  ;;  %v4568_v33 = vld [vmem:[#allocation27_spill] sm:$0xff] }
 0x100   : > { %v3419_v0 = vsel %vm1399_vm3, %v1390_v27, %v715_v46  ;;  %v713_v48 = vpop.permute.xlu0 %712  ;;  %2247 = vmatprep.subr.msk.mxu0 %vm1739_vm4, %v1634_v57  ;;  %2307 = vmatprep.subr.msk.mxu1 %vm1739_vm4, %v1634_v57 }
 0x101   : > { %v3422_v12 = vsel %vm1399_vm3, %v1389_v28, %v713_v48  ;;  %904 = vrot.lane.b32.xlu1 %v4563_v34, %s2480_s21  ;;  %v4565_v48 = vld [vmem:[#allocation64_spill] sm:$0xff] }
 0x102   : > { %1201 = vrot.lane.b32.xlu0 %v4563_v34, %s2483_s6 }
 0x103   : > { %v719_v2 = vpop.permute.xlu1 %718  ;;  %2248 = vmatpush3.msk.msra.mxu0 %vm1739_vm4, %v1634_v57  ;;  %2310 = vmatpush3.msk.msra.mxu1 %vm1739_vm4, %v1634_v57  ;;  %v4567_v57 = vld [vmem:[#allocation65_spill] sm:$0xff] }
 0x104   : > { %v3438_v15 = vsel %vm1399_vm3, %v1392_v49, %v719_v2  ;;  %v717_v30 = vpop.permute.xlu0 %716  ;;  %v1397_v19 = vsel %vm1366_vm2, %v4568_v33, %v4567_v57  ;;  %v4576_v33 = vld [vmem:[#allocation47_spill] sm:$0xff] }
 0x105   : > { %v3441_v44 = vsel %vm1399_vm3, %v1391_v13, %v717_v30  ;;  %1203 = vrot.lane.b32.xlu1 %v4564_v11, %s2483_s6 }
 0x106   : > { %1171 = vrot.lane.b32.xlu0 %v2639_v25, %s2483_s6  ;;  %v1396_v25 = vsel %vm1366_vm2, %v2868_v41, %v3227_v16  ;;  %v4566_v41 = vld [vmem:[#allocation26_spill] sm:$0xff] }
 0x107   : > { %v723_v31 = vpop.permute.xlu1 %722  ;;  %v1398_v16 = vsel %vm1366_vm2, %v4566_v41, %v4565_v48  ;;  %v4571_v48 = vld [vmem:[#allocation21_spill] sm:$0xff]  ;;  %v4572_v41 = vld [vmem:[#allocation20_spill] sm:$0xff] }
 0x108   : > { %v3454_v36 = vsel %vm1399_vm3, %v1394_v45, %v723_v31  ;;  %v721_v37 = vpop.permute.xlu0 %720  ;;  %v4570_v45 = vld [vmem:[#allocation45_spill] sm:$0xff] }
 0x109   : > { %v3457_v10 = vsel %vm1399_vm3, %v1393_v52, %v721_v37  ;;  %1302 = vrot.lane.b32.xlu1 %v3058_v35, %s2484_s29 }
 0x10a   : > { %1270 = vrot.lane.b32.xlu0 %v2954_v14, %s2484_s29 }
 0x10b   : > { %v727_v62 = vpop.permute.xlu1 %726 }
 0x10c   : > { %v3470_v27 = vsel %vm1399_vm3, %v1396_v25, %v727_v62  ;;  %v725_v46 = vpop.permute.xlu0 %724 }
 0x10d   : > { %v3473_v28 = vsel %vm1399_vm3, %v1395_v3, %v725_v46  ;;  %973 = vrot.lane.b32.xlu1 %v2954_v14, %s2481_s22  ;;  %v4569_v14 = vld [vmem:[#allocation32_spill] sm:$0xff] }
 0x10e   : > { %906 = vrot.lane.b32.xlu0 %v4564_v11, %s2480_s21 }
 0x10f   : > { %v731_v34 = vpop.permute.xlu1 %730 }
 0x110   : > { %v3486_v49 = vsel %vm1399_vm3, %v1398_v16, %v731_v34  ;;  %v729_v2 = vpop.permute.xlu0 %728 }
 0x111   : > { %v3489_v13 = vsel %vm1399_vm3, %v1397_v19, %v729_v2  ;;  %1272 = vrot.lane.b32.xlu1 %v4569_v14, %s2484_s29 }
 0x112   : > { %1005 = vrot.lane.b32.xlu0 %v3058_v35, %s2481_s22 }
 0x113   : > { %v3495_v30 = vpop.permute.xlu1 %768 }
 0x114   : > { %v3497_v11 = vpop.permute.xlu0 %766 }
 0x115   : > { %975 = vrot.lane.b32.xlu1 %v4569_v14, %s2481_s22 }
 0x116   : > { %1304 = vrot.lane.b32.xlu0 %v4570_v45, %s2484_s29 }
 0x117   : > { %v3503_v31 = vpop.permute.xlu1 %772 }
 0x118   : > { %v3505_v52 = vpop.permute.xlu0 %770 }
 0x119   : > { %1071 = vrot.lane.b32.xlu1 %v2633_v24, %s2482_s24 }
 0x11a   : > { %1007 = vrot.lane.b32.xlu0 %v4570_v45, %s2481_s22 }
 0x11b   : > { %v777_v35 = vpop.permute.xlu1 %776 }
 0x11c   : > { %v3513_v37 = vsel %vm1432_vm5, %v3279_v5, %v777_v35  ;;  %v775_v25 = vpop.permute.xlu0 %774  ;;  %v4580_v35 = vld [vmem:[#allocation46_spill] sm:$0xff] }
 0x11d   : > { %v3517_v62 = vsel %vm1432_vm5, %v3282_v8, %v775_v25  ;;  %1073 = vrot.lane.b32.xlu1 %v2627_v22, %s2482_s24  ;;  %v4581_v25 = vld [vmem:[#allocation33_spill] sm:$0xff] }
 0x11e   : > { %1103 = vrot.lane.b32.xlu0 %v2808_v59, %s2482_s24 }
 0x11f   : > { %v781_v24 = vpop.permute.xlu1 %780 }
 0x120   : > { %v3525_v3 = vsel %vm1432_vm5, %v3295_v58, %v781_v24  ;;  %v779_v46 = vpop.permute.xlu0 %778 }
 0x121   : > { %v3529_v5 = vsel %vm1432_vm5, %v3298_v4, %v779_v46  ;;  %1173 = vrot.lane.b32.xlu1 %v4561_v63, %s2483_s6 }
 0x122   : > { %1105 = vrot.lane.b32.xlu0 %v2802_v53, %s2482_s24 }
 0x123   : > { %v785_v22 = vpop.permute.xlu1 %784 }
 0x124   : > { %v3537_v59 = vsel %vm1432_vm5, %v3311_v55, %v785_v22  ;;  %v783_v8 = vpop.permute.xlu0 %782 }
 0x125   : > { %v3541_v58 = vsel %vm1432_vm5, %v3314_v42, %v783_v8  ;;  %908 = vrot.lane.b32.xlu1 %v4571_v48, %s2480_s21  ;;  %v4573_v42 = vld [vmem:[#allocation5_spill] sm:$0xff] }
 0x126   : > { %1205 = vrot.lane.b32.xlu0 %v4571_v48, %s2483_s6 }
 0x127   : > { %v789_v4 = vpop.permute.xlu1 %788 }
 0x128   : > { %v3549_v53 = vsel %vm1432_vm5, %v3327_v6, %v789_v4  ;;  %v787_v63 = vpop.permute.xlu0 %786 }
 0x129   : > { %v3553_v55 = vsel %vm1432_vm5, %v3330_v61, %v787_v63  ;;  %1207 = vrot.lane.b32.xlu1 %v4572_v41, %s2483_s6  ;;  %v4577_v61 = vld [vmem:[#allocation34_spill] sm:$0xff] }
 0x12a   : > { %1175 = vrot.lane.b32.xlu0 %v4573_v42, %s2483_s6 }
 0x12b   : > { %v793_v16 = vpop.permute.xlu1 %792 }
 0x12c   : > { %v3561_v34 = vsel %vm1432_vm5, %v3343_v47, %v793_v16  ;;  %v791_v57 = vpop.permute.xlu0 %790 }
 0x12d   : > { %4574 = vst [vmem:[#allocation6_spill] sm:$0xff] %v3561_v34  ;;  %v3565_v6 = vsel %vm1432_vm5, %v3346_v29, %v791_v57  ;;  %1306 = vrot.lane.b32.xlu1 %v4576_v33, %s2484_s29  ;;  %v4582_v57 = vld [vmem:[#allocation23_spill] sm:$0xff] }
 0x12e   : > { %4575 = vst [vmem:[#allocation17_spill] sm:$0xff] %v3565_v6  ;;  %1274 = vrot.lane.b32.xlu0 %v4577_v61, %s2484_s29 }
 0x12f   : > { %v797_v19 = vpop.permute.xlu1 %796 }
 0x130   : > { %v3573_v2 = vsel %vm1432_vm5, %v3359_v1, %v797_v19  ;;  %v795_v14 = vpop.permute.xlu0 %794 }
 0x131   : > { %4578 = vst [vmem:[#allocation19_spill] sm:$0xff] %v3573_v2  ;;  %v3577_v47 = vsel %vm1432_vm5, %v3362_v17, %v795_v14  ;;  %910 = vrot.lane.b32.xlu1 %v4572_v41, %s2480_s21  ;;  %v3722_v2 = vld [vmem:[%s2577_s7 + $0xc0] sm:$0xff] }
 0x132   : > { %4579 = vst [vmem:[#allocation18_spill] sm:$0xff] %v3577_v47  ;;  %878 = vrot.lane.b32.xlu0 %v4573_v42, %s2480_s21  ;;  %v4597_v47 = vld [vmem:[#allocation53_spill] sm:$0xff] }
 0x133   : > { %v3583_v29 = vpop.permute.xlu1 %800 }
 0x134   : > { %v3585_v45 = vpop.permute.xlu0 %798 }
 0x135   : > { %1009 = vrot.lane.b32.xlu1 %v4576_v33, %s2481_s22 }
 0x136   : > { %977 = vrot.lane.b32.xlu0 %v4577_v61, %s2481_s22 }
 0x137   : > { %v3591_v1 = vpop.permute.xlu1 %804 }
 0x138   : > { %v3593_v17 = vpop.permute.xlu0 %802 }
 0x139   : > { %1308 = vrot.lane.b32.xlu1 %v4580_v35, %s2484_s29 }
 0x13a   : > { %1276 = vrot.lane.b32.xlu0 %v4581_v25, %s2484_s29 }
 0x13b   : > { %v809_v24 = vpop.permute.xlu1 %808 }
 0x13c   : > { %v3601_v46 = vsel %vm1432_vm5, %v3397_v38, %v809_v24  ;;  %v807_v22 = vpop.permute.xlu0 %806 }
 0x13d   : > { %v3605_v8 = vsel %vm1432_vm5, %v3400_v40, %v807_v22  ;;  %1011 = vrot.lane.b32.xlu1 %v4580_v35, %s2481_s22  ;;  %v4588_v35 = vld [vmem:[#allocation22_spill] sm:$0xff]  ;;  %v4590_v22 = vld [vmem:[#allocation49_spill] sm:$0xff] }
 0x13e   : > { %979 = vrot.lane.b32.xlu0 %v4581_v25, %s2481_s22 }
 0x13f   : > { %v813_v48 = vpop.permute.xlu1 %812 }
 0x140   : > { %v3613_v4 = vsel %vm1432_vm5, %v3419_v0, %v813_v48  ;;  %v811_v63 = vpop.permute.xlu0 %810 }
 0x141   : > { %v3617_v38 = vsel %vm1432_vm5, %v3422_v12, %v811_v63  ;;  %1107 = vrot.lane.b32.xlu1 %v2830_v20, %s2482_s24  ;;  %v2378_v12 = vld [vmem:[%s2577_s7 + $0x68] sm:$0xff] }
 0x142   : > { %1075 = vrot.lane.b32.xlu0 %v2654_v32, %s2482_s24 }
 0x143   : > { %v817_v40 = vpop.permute.xlu1 %816 }
 0x144   : > { %v3625_v41 = vsel %vm1432_vm5, %v3438_v15, %v817_v40  ;;  %v815_v42 = vpop.permute.xlu0 %814 }
 0x145   : > { %v3629_v0 = vsel %vm1432_vm5, %v3441_v44, %v815_v42  ;;  %1109 = vrot.lane.b32.xlu1 %v2824_v26, %s2482_s24  ;;  %v4583_v44 = vld [vmem:[#allocation8_spill] sm:$0xff] }
 0x146   : > { %1077 = vrot.lane.b32.xlu0 %v2378_v12, %s2482_s24 }
 0x147   : > { %v821_v20 = vpop.permute.xlu1 %820 }
 0x148   : > { %v3637_v32 = vsel %vm1432_vm5, %v3454_v36, %v821_v20  ;;  %v819_v16 = vpop.permute.xlu0 %818  ;;  %v4592_v20 = vld [vmem:[#allocation48_spill] sm:$0xff] }
 0x149   : > { %v3641_v15 = vsel %vm1432_vm5, %v3457_v10, %v819_v16  ;;  %1209 = vrot.lane.b32.xlu1 %v4582_v57, %s2483_s6  ;;  %v4593_v16 = vld [vmem:[#allocation35_spill] sm:$0xff] }
 0x14a   : > { %1177 = vrot.lane.b32.xlu0 %v4583_v44, %s2483_s6 }
 0x14b   : > { %v825_v26 = vpop.permute.xlu1 %824 }
 0x14c   : > { %v3649_v33 = vsel %vm1432_vm5, %v3470_v27, %v825_v26  ;;  %v823_v61 = vpop.permute.xlu0 %822 }
 0x14d   : > { %4584 = vst [vmem:[#allocation64_spill] sm:$0xff] %v3649_v33  ;;  %v3653_v36 = vsel %vm1432_vm5, %v3473_v28, %v823_v61  ;;  %912 = vrot.lane.b32.xlu1 %v4582_v57, %s2480_s21  ;;  %v4589_v28 = vld [vmem:[#allocation7_spill] sm:$0xff] }
 0x14e   : > { %4585 = vst [vmem:[#allocation26_spill] sm:$0xff] %v3653_v36  ;;  %880 = vrot.lane.b32.xlu0 %v4583_v44, %s2480_s21  ;;  %v4598_v33 = vld [vmem:[#allocation67_spill] sm:$0xff] }
 0x14f   : > { %v829_v10 = vpop.permute.xlu1 %828 }
 0x150   : > { %v3661_v19 = vsel %vm1432_vm5, %v3486_v49, %v829_v10  ;;  %v827_v14 = vpop.permute.xlu0 %826  ;;  %v4591_v49 = vld [vmem:[#allocation36_spill] sm:$0xff] }
 0x151   : > { %4586 = vst [vmem:[#allocation65_spill] sm:$0xff] %v3661_v19  ;;  %v3665_v27 = vsel %vm1432_vm5, %v3489_v13, %v827_v14  ;;  %1211 = vrot.lane.b32.xlu1 %v4588_v35, %s2483_s6  ;;  %v2379_v10 = vld [vmem:[%s2577_s7 + $0x78] sm:$0xff]  ;;  %v4596_v19 = vld [vmem:[#allocation61_spill] sm:$0xff] }
 0x152   : > { %4587 = vst [vmem:[#allocation27_spill] sm:$0xff] %v3665_v27  ;;  %1179 = vrot.lane.b32.xlu0 %v4589_v28, %s2483_s6 }
 0x153   : > { %v3671_v25 = vpop.permute.xlu1 %870 }
 0x154   : > { %v869_v24 = vpop.permute.xlu0 %868 }
 0x155   : > { %1310 = vrot.lane.b32.xlu1 %v4590_v22, %s2484_s29 }
 0x156   : > { %1278 = vrot.lane.b32.xlu0 %v4591_v49, %s2484_s29 }
 0x157   : > { %v3677_v48 = vpop.permute.xlu1 %874 }
 0x158   : > { %v3679_v63 = vpop.permute.xlu0 %872 }
 0x159   : > { %914 = vrot.lane.b32.xlu1 %v4588_v35, %s2480_s21 }
 0x15a   : > { %882 = vrot.lane.b32.xlu0 %v4589_v28, %s2480_s21  ;;  %v2380_v28 = vld [vmem:[%s2577_s7 + $0x80] sm:$0xff] }
 0x15b   : > { %v901_v13 = vpop.permute.xlu1 %900 }
 0x15c   : > { %v3685_v40 = vpop.permute.xlu0 %876 }
 0x15d   : > { %1013 = vrot.lane.b32.xlu1 %v4590_v22, %s2481_s22 }
 0x15e   : > { %981 = vrot.lane.b32.xlu0 %v4591_v49, %s2481_s22 }
 0x15f   : > { %v970_v42 = vpop.permute.xlu1 %969 }
 0x160   : > { %v3691_v12 = vpop.permute.xlu0 %902 }
 0x161   : > { %1312 = vrot.lane.b32.xlu1 %v4592_v20, %s2484_s29 }
 0x162   : > { %1280 = vrot.lane.b32.xlu0 %v4593_v16, %s2484_s29 }
 0x163   : > { %v3697_v57 = vpop.permute.xlu1 %971 }
 0x164   : > { %v1002_v44 = vpop.permute.xlu0 %1001 }
 0x165   : > { %1015 = vrot.lane.b32.xlu1 %v4592_v20, %s2481_s22  ;;  %v4594_v20 = vld [vmem:[#allocation25_spill] sm:$0xff] }
 0x166   : > { %983 = vrot.lane.b32.xlu0 %v4593_v16, %s2481_s22 }
 0x167   : > { %v1068_v26 = vpop.permute.xlu1 %1067 }
 0x168   : > { %v3703_v61 = vpop.permute.xlu0 %1003 }
 0x169   : > { %1111 = vrot.lane.b32.xlu1 %v2852_v60, %s2482_s24  ;;  %v4595_v60 = vld [vmem:[#allocation10_spill] sm:$0xff] }
 0x16a   : > { %1079 = vrot.lane.b32.xlu0 %v2379_v10, %s2482_s24 }
 0x16b   : > { %v1070_v14 = vpop.permute.xlu1 %1069 }
 0x16c   : > { %v1100_v35 = vpop.permute.xlu0 %1099 }
 0x16d   : > { %1113 = vrot.lane.b32.xlu1 %v2846_v9, %s2482_s24  ;;  %v1383_v9 = vsel %vm1366_vm2, %v3722_v2, %v4596_v19 }
 0x16e   : > { %1081 = vrot.lane.b32.xlu0 %v2380_v28, %s2482_s24  ;;  %v2382_v28 = vld [vmem:[%s2577_s7] sm:$0xff]  ;;  %v1416_v34 = vsel %vm1399_vm3, %v1383_v9, %v3370_v54 }
 0x16f   : > { %v1170_v22 = vpop.permute.xlu1 %1169  ;;  %v1367_v27 = vsel %vm1366_vm2, %v2382_v28, %v4597_v47  ;;  %v1449_v19 = vsel %vm1432_vm5, %v1416_v34, %v3585_v45 }
 0x170   : > { %v3713_v49 = vpop.permute.xlu0 %1101  ;;  %v1400_v6 = vsel %vm1399_vm3, %v1367_v27, %v4598_v33  ;;  %v1482_v47 = vsel %vm1465_vm6, %v1449_v19, %v901_v13  ;;  %v4599_v33 = vld [vmem:[#allocation24_spill] sm:$0xff]  ;;  %v2383_v19 = vld [vmem:[%s2577_s7 + $0x8] sm:$0xff] }
 0x171   : > { %1213 = vrot.lane.b32.xlu1 %v4594_v20, %s2483_s6 }
 0x172   : > { %1181 = vrot.lane.b32.xlu0 %v4595_v60, %s2483_s6 }
 0x173   : > { %v3719_v16 = vpop.permute.xlu1 %904 }
 0x174   : > { %v1202_v10 = vpop.permute.xlu0 %1201 }
 0x175   : > { %916 = vrot.lane.b32.xlu1 %v4594_v20, %s2480_s21  ;;  %v1433_v20 = vsel %vm1432_vm5, %v1400_v6, %v3497_v11  ;;  %v4600_v11 = vld [vmem:[#allocation9_spill] sm:$0xff] }
 0x176   : > { %884 = vrot.lane.b32.xlu0 %v4595_v60, %s2480_s21  ;;  %v1466_v54 = vsel %vm1465_vm6, %v1433_v20, %v869_v24  ;;  %v1515_v60 = vsel %vm1498_vm7, %v1482_v47, %v1002_v44  ;;  %v4601_v20 = vld [vmem:[#allocation57_spill] sm:$0xff] }
 0x177   : > { %v1204_v36 = vpop.permute.xlu1 %1203  ;;  %v1499_v34 = vsel %vm1498_vm7, %v1466_v54, %v970_v42  ;;  %v1548_v45 = vsel %vm1531_vm8, %v1515_v60, %v1100_v35  ;;  %v1368_v42 = vsel %vm1366_vm2, %v2383_v19, %v4601_v20  ;;  %v4602_v35 = vld [vmem:[#allocation52_spill] sm:$0xff] }
 0x178   : > { %v1172_v28 = vpop.permute.xlu0 %1171  ;;  %v1532_v6 = vsel %vm1531_vm8, %v1499_v34, %v1068_v26  ;;  %v1581_v27 = vsel %vm1564_vm9, %v1548_v45, %v1202_v10  ;;  %v4603_v26 = vld [vmem:[#allocation66_spill] sm:$0xff] }
 0x179   : > { %1215 = vrot.lane.b32.xlu1 %v4599_v33, %s2483_s6  ;;  %v1565_v13 = vsel %vm1564_vm9, %v1532_v6, %v1170_v22  ;;  %v1401_v10 = vsel %vm1399_vm3, %v1368_v42, %v4603_v26  ;;  %v4604_v22 = vld [vmem:[#allocation38_spill] sm:$0xff]  ;;  %v2385_v26 = vld [vmem:[%s2577_s7 + $0x150] sm:$0xff] }
 0x17a   : > { %1183 = vrot.lane.b32.xlu0 %v4600_v11, %s2483_s6  ;;  %v1434_v54 = vsel %vm1432_vm5, %v1401_v10, %v3495_v30  ;;  %v4606_v42 = vld [vmem:[#allocation50_spill] sm:$0xff]  ;;  %v2386_v10 = vld [vmem:[%s2577_s7 + $0x90] sm:$0xff] }
 0x17b   : > { %v1303_v24 = vpop.permute.xlu1 %1302  ;;  %v1467_v34 = vsel %vm1465_vm6, %v1434_v54, %v3671_v25 }
 0x17c   : > { %v1271_v44 = vpop.permute.xlu0 %1270  ;;  %v1614_v9 = vsel %vm1597_vm10, %v1581_v27, %v1303_v24  ;;  %v1500_v6 = vsel %vm1498_vm7, %v1467_v34, %v3697_v57  ;;  %v3780_v27 = vld [vmem:[%s2577_s7 + $0xc8] sm:$0xff]  ;;  %v4605_v24 = vld [vmem:[#allocation60_spill] sm:$0xff] }
 0x17d   : > { %1314 = vrot.lane.b32.xlu1 %v4602_v35, %s2484_s29  ;;  %v1598_v47 = vsel %vm1597_vm10, %v1565_v13, %v1271_v44  ;;  %2273 = vmatprep.mubr.msk.f32.mxu1 %vm1642_vm11, %v1614_v9  ;;  %v1384_v13 = vsel %vm1366_vm2, %v3780_v27, %v4605_v24  ;;  %v1533_v30 = vsel %vm1531_vm8, %v1500_v6, %v1070_v14  ;;  %v2387_v34 = vld [vmem:[%s2577_s7 + $0x158] sm:$0xff] }
 0x17e   : > { %1282 = vrot.lane.b32.xlu0 %v4604_v22, %s2484_s29  ;;  %2249 = vmatprep.mubr.msk.f32.mxu0 %vm1642_vm11, %v1598_v47  ;;  %v1417_v25 = vsel %vm1399_vm3, %v1384_v13, %v3368_v51  ;;  %v1566_v44 = vsel %vm1564_vm9, %v1533_v30, %v1172_v28  ;;  %v2388_v6 = vld [vmem:[%s2577_s7 + $0x98] sm:$0xff] }
 0x17f   : > { %v3769_v60 = vpop.permute.xlu1 %973  ;;  %v3833_v30 = vld [vmem:[%s2577_s7 + $0xd8] sm:$0xff] }
 0x180   : > { %v3773_v45 = vpop.permute.xlu0 %906 }
 0x181   : > { %918 = vrot.lane.b32.xlu1 %v4599_v33, %s2480_s21  ;;  %v1450_v33 = vsel %vm1432_vm5, %v1417_v25, %v3583_v29  ;;  %v4608_v25 = vld [vmem:[#allocation63_spill] sm:$0xff] }
 0x182   : > { %886 = vrot.lane.b32.xlu0 %v4600_v11, %s2480_s21  ;;  %v1483_v20 = vsel %vm1465_vm6, %v1450_v33, %v3691_v12  ;;  %v2390_v33 = vld [vmem:[%s2577_s7 + $0x18] sm:$0xff] }
 0x183   : > { %v1273_v57 = vpop.permute.xlu1 %1272  ;;  %v1516_v51 = vsel %vm1498_vm7, %v1483_v20, %v3703_v61  ;;  %v4607_v61 = vld [vmem:[#allocation37_spill] sm:$0xff] }
 0x184   : > { %v1599_v9 = vsel %vm1597_vm10, %v1566_v44, %v1273_v57  ;;  %v1006_v19 = vpop.permute.xlu0 %1005  ;;  %v1549_v29 = vsel %vm1531_vm8, %v1516_v51, %v3713_v49  ;;  %v1385_v44 = vsel %vm1366_vm2, %v3833_v30, %v4608_v25  ;;  %v4609_v57 = vld [vmem:[#allocation29_spill] sm:$0xff] }
 0x185   : > { %1017 = vrot.lane.b32.xlu1 %v4602_v35, %s2481_s22  ;;  %2250 = vmatmul.mubr.msk.f32.vlgmr.msra.gmra.mrb[0].mxu0 %vm1642_vm11, %v1599_v9  ;;  %v1582_v12 = vsel %vm1564_vm9, %v1549_v29, %v1204_v36  ;;  %v4610_v9 = vld [vmem:[#allocation51_spill] sm:$0xff]  ;;  %v1418_v51 = vsel %vm1399_vm3, %v1385_v44, %v3378_v39  ;;  %v4611_v29 = vld [vmem:[#allocation12_spill] sm:$0xff] }
 0x186   : > { %985 = vrot.lane.b32.xlu0 %v4604_v22, %s2481_s22  ;;  %v1369_v20 = vsel %vm1366_vm2, %v2390_v33, %v4610_v9  ;;  %v4615_v33 = vld [vmem:[#allocation62_spill] sm:$0xff] }
 0x187   : > { %v3805_v14 = vpop.permute.xlu1 %975 }
 0x188   : > { %v1305_v28 = vpop.permute.xlu0 %1304 }
 0x189   : > { %v1615_v11 = vsel %vm1597_vm10, %v1582_v12, %v1305_v28  ;;  %1316 = vrot.lane.b32.xlu1 %v4606_v42, %s2484_s29  ;;  %v4612_v12 = vld [vmem:[#allocation69_spill] sm:$0xff] }
 0x18a   : > { %1284 = vrot.lane.b32.xlu0 %v4607_v61, %s2484_s29  ;;  %2274 = vmatmul.mubr.msk.f32.vlgmr.msra.gmra.mrb[0].mxu1 %vm1642_vm11, %v1615_v11  ;;  %v1402_v28 = vsel %vm1399_vm3, %v1369_v20, %v4612_v12  ;;  %v1451_v11 = vsel %vm1432_vm5, %v1418_v51, %v3593_v17  ;;  %v4616_v20 = vld [vmem:[#allocation56_spill] sm:$0xff]  ;;  %v2392_v51 = vld [vmem:[%s2577_s7 + $0x20] sm:$0xff] }
 0x18b   : > { %v1072_v35 = vpop.permute.xlu1 %1071 }
 0x18c   : > { %v3814_v49 = vpop.permute.xlu0 %1007 }
 0x18d   : > { %1019 = vrot.lane.b32.xlu1 %v4606_v42, %s2481_s22 }
 0x18e   : > { %987 = vrot.lane.b32.xlu0 %v4607_v61, %s2481_s22  ;;  %v1435_v61 = vsel %vm1432_vm5, %v1402_v28, %v3505_v52 }
 0x18f   : > { %v3820_v36 = vpop.permute.xlu1 %1073  ;;  %v1468_v39 = vsel %vm1465_vm6, %v1435_v61, %v3679_v63  ;;  %v4619_v61 = vld [vmem:[#allocation68_spill] sm:$0xff] }
 0x190   : > { %v1104_v47 = vpop.permute.xlu0 %1103 }
 0x191   : > { %1115 = vrot.lane.b32.xlu1 %v2385_v26, %s2482_s24  ;;  %v1484_v26 = vsel %vm1465_vm6, %v1451_v11, %v3719_v16  ;;  %v4618_v11 = vld [vmem:[#allocation40_spill] sm:$0xff] }
 0x192   : > { %1083 = vrot.lane.b32.xlu0 %v2386_v10, %s2482_s24 }
 0x193   : > { %v1174_v22 = vpop.permute.xlu1 %1173 }
 0x194   : > { %v1106_v54 = vpop.permute.xlu0 %1105 }
 0x195   : > { %1117 = vrot.lane.b32.xlu1 %v2387_v34, %s2482_s24  ;;  %v1517_v34 = vsel %vm1498_vm7, %v1484_v26, %v1006_v19 }
 0x196   : > { %1085 = vrot.lane.b32.xlu0 %v2388_v6, %s2482_s24  ;;  %v1501_v6 = vsel %vm1498_vm7, %v1468_v39, %v3769_v60  ;;  %v1550_v17 = vsel %vm1531_vm8, %v1517_v34, %v1104_v47  ;;  %v4613_v60 = vld [vmem:[#allocation28_spill] sm:$0xff]  ;;  %v4614_v47 = vld [vmem:[#allocation11_spill] sm:$0xff] }
 0x197   : > { %v3830_v24 = vpop.permute.xlu1 %908  ;;  %v1534_v52 = vsel %vm1531_vm8, %v1501_v6, %v1072_v35 }
 0x198   : > { %v1206_v13 = vpop.permute.xlu0 %1205  ;;  %v1567_v19 = vsel %vm1564_vm9, %v1534_v52, %v1174_v22  ;;  %v3881_v22 = vld [vmem:[%s2577_s7 + $0xe0] sm:$0xff] }
 0x199   : > { %1217 = vrot.lane.b32.xlu1 %v4609_v57, %s2483_s6  ;;  %v1583_v16 = vsel %vm1564_vm9, %v1550_v17, %v1206_v13  ;;  %v1386_v9 = vsel %vm1366_vm2, %v3881_v22, %v4615_v33  ;;  %v2393_v33 = vld [vmem:[%s2577_s7 + $0x168] sm:$0xff] }
 0x19a   : > { %1185 = vrot.lane.b32.xlu0 %v4611_v29, %s2483_s6  ;;  %v1419_v28 = vsel %vm1399_vm3, %v1386_v9, %v3376_v56  ;;  %v2394_v9 = vld [vmem:[%s2577_s7 + $0xa8] sm:$0xff] }
 0x19b   : > { %v1208_v42 = vpop.permute.xlu1 %1207  ;;  %v1452_v39 = vsel %vm1432_vm5, %v1419_v28, %v3591_v1 }
 0x19c   : > { %v1176_v10 = vpop.permute.xlu0 %1175  ;;  %v1485_v17 = vsel %vm1465_vm6, %v1452_v39, %v3773_v45 }
 0x19d   : > { %920 = vrot.lane.b32.xlu1 %v4609_v57, %s2480_s21 }
 0x19e   : > { %888 = vrot.lane.b32.xlu0 %v4611_v29, %s2480_s21  ;;  %v4617_v29 = vld [vmem:[#allocation55_spill] sm:$0xff] }
 0x19f   : > { %v1307_v63 = vpop.permute.xlu1 %1306  ;;  %v1370_v12 = vsel %vm1366_vm2, %v2392_v51, %v4617_v29  ;;  %v2395_v29 = vld [vmem:[%s2577_s7 + $0x170] sm:$0xff] }
 0x1a0   : > { %v1616_v25 = vsel %vm1597_vm10, %v1583_v16, %v1307_v63  ;;  %v1275_v44 = vpop.permute.xlu0 %1274  ;;  %v1403_v26 = vsel %vm1399_vm3, %v1370_v12, %v4619_v61  ;;  %v1518_v16 = vsel %vm1498_vm7, %v1485_v17, %v3814_v49  ;;  %v2396_v12 = vld [vmem:[%s2577_s7 + $0xb0] sm:$0xff]  ;;  %s268_s7 = sand.u32 1, %s2459_s16  }
 0x1a1   : > { %v1600_v57 = vsel %vm1597_vm10, %v1567_v19, %v1275_v44  ;;  %1219 = vrot.lane.b32.xlu1 %v4613_v60, %s2483_s6  ;;  %2276 = vmatprep.mubr.msk.f32.mxu1 %vm1642_vm11, %v1616_v25  ;;  %v1436_v6 = vsel %vm1432_vm5, %v1403_v26, %v3503_v31  ;;  %v1551_v63 = vsel %vm1531_vm8, %v1518_v16, %v1106_v54  ;;  %v4620_v54 = vld [vmem:[#allocation54_spill] sm:$0xff]  ;;  %v4622_v61 = vld [vmem:[#allocation31_spill] sm:$0xff]  ;;  %s4342_s18 = scalar_lea.sflag [#allocation3], %s268_s7 }
 0x1a2   : > { %1187 = vrot.lane.b32.xlu0 %v4614_v47, %s2483_s6  ;;  %2252 = vmatprep.mubr.msk.f32.mxu0 %vm1642_vm11, %v1600_v57  ;;  %v1469_v56 = vsel %vm1465_vm6, %v1436_v6, %v3677_v48  ;;  %v1584_v45 = vsel %vm1564_vm9, %v1551_v63, %v1208_v42  ;;  %v4621_v42 = vld [vmem:[#allocation39_spill] sm:$0xff]  ;;  %v4623_v26 = vld [vmem:[#allocation14_spill] sm:$0xff]  ;;  %v1486_v6 = vsel %vm1465_vm6, %v3605_v8, %v3830_v24 }
 0x1a3   : > { %v3876_v35 = vpop.permute.xlu1 %910  ;;  %v1502_v1 = vsel %vm1498_vm7, %v1469_v56, %v3805_v14  ;;  %v1470_v56 = vsel %vm1465_vm6, %v3517_v62, %v3685_v40 }
 0x1a4   : > { %v3878_v13 = vpop.permute.xlu0 %878  ;;  %v1535_v31 = vsel %vm1531_vm8, %v1502_v1, %v3820_v36 }
 0x1a5   : > { %1318 = vrot.lane.b32.xlu1 %v4616_v20, %s2484_s29  ;;  %v1568_v19 = vsel %vm1564_vm9, %v1535_v31, %v1176_v10 }
 0x1a6   : > { %1286 = vrot.lane.b32.xlu0 %v4618_v11, %s2484_s29 }
 0x1a7   : > { %v1010_v34 = vpop.permute.xlu1 %1009 }
 0x1a8   : > { %v978_v52 = vpop.permute.xlu0 %977  ;;  %v1519_v16 = vsel %vm1498_vm7, %v1486_v6, %v1010_v34 }
 0x1a9   : > { %922 = vrot.lane.b32.xlu1 %v4613_v60, %s2480_s21  ;;  %v1503_v1 = vsel %vm1498_vm7, %v1470_v56, %v978_v52  ;;  %v4625_v52 = vld [vmem:[#allocation13_spill] sm:$0xff]  ;;  %v863_v56 = vrot.slane %v3273_v43, 1 }
 0x1aa   : > { %890 = vrot.lane.b32.xlu0 %v4614_v47, %s2480_s21 }
 0x1ab   : > { %v1309_v48 = vpop.permute.xlu1 %1308 }
 0x1ac   : > { %v1617_v49 = vsel %vm1597_vm10, %v1584_v45, %v1309_v48  ;;  %v1277_v25 = vpop.permute.xlu0 %1276  ;;  %v4624_v48 = vld [vmem:[#allocation30_spill] sm:$0xff] }
 0x1ad   : > { %v1601_v44 = vsel %vm1597_vm10, %v1568_v19, %v1277_v25  ;;  %1021 = vrot.lane.b32.xlu1 %v4616_v20, %s2481_s22  ;;  %2277 = vmatmul.mubr.msk.f32.gmra.mrb[2].mxu1 %vm1642_vm11, %v1617_v49  ;;  %v4626_v25 = vld [vmem:[#allocation59_spill] sm:$0xff] }
 0x1ae   : > { %989 = vrot.lane.b32.xlu0 %v4618_v11, %s2481_s22  ;;  %2253 = vmatmul.mubr.msk.f32.gmra.mrb[2].mxu0 %vm1642_vm11, %v1601_v44  ;;  %v4627_v44 = vld [vmem:[#allocation42_spill] sm:$0xff] }
 0x1af   : > { %v1012_v14 = vpop.permute.xlu1 %1011 }
 0x1b0   : > { %v980_v36 = vpop.permute.xlu0 %979 }
 0x1b1   : > { %1320 = vrot.lane.b32.xlu1 %v4620_v54, %s2484_s29 }
 0x1b2   : > { %1288 = vrot.lane.b32.xlu0 %v4621_v42, %s2484_s29 }
 0x1b3   : > { %v1108_v10 = vpop.permute.xlu1 %1107 }
 0x1b4   : > { %v1076_v57 = vpop.permute.xlu0 %1075  ;;  %v1552_v63 = vsel %vm1531_vm8, %v1519_v16, %v1108_v10 }
 0x1b5   : > { %1023 = vrot.lane.b32.xlu1 %v4620_v54, %s2481_s22  ;;  %v1536_v31 = vsel %vm1531_vm8, %v1503_v1, %v1076_v57  ;;  %v1471_v57 = vsel %vm1465_vm6, %v3513_v37, %v3878_v13 }
 0x1b6   : > { %991 = vrot.lane.b32.xlu0 %v4621_v42, %s2481_s22  ;;  %v1487_v42 = vsel %vm1465_vm6, %v3601_v46, %v3876_v35 }
 0x1b7   : > { %v1110_v60 = vpop.permute.xlu1 %1109 }
 0x1b8   : > { %v1078_v47 = vpop.permute.xlu0 %1077 }
 0x1b9   : > { %1119 = vrot.lane.b32.xlu1 %v2393_v33, %s2482_s24  ;;  %v1520_v33 = vsel %vm1498_vm7, %v1487_v42, %v1012_v14 }
 0x1ba   : > { %1087 = vrot.lane.b32.xlu0 %v2394_v9, %s2482_s24  ;;  %v1504_v9 = vsel %vm1498_vm7, %v1471_v57, %v980_v36 }
 0x1bb   : > { %v1210_v20 = vpop.permute.xlu1 %1209 }
 0x1bc   : > { %v1178_v51 = vpop.permute.xlu0 %1177  ;;  %v1585_v8 = vsel %vm1564_vm9, %v1552_v63, %v1210_v20  ;;  %v1553_v20 = vsel %vm1531_vm8, %v1520_v33, %v1110_v60 }
 0x1bd   : > { %1121 = vrot.lane.b32.xlu1 %v2395_v29, %s2482_s24  ;;  %v1569_v45 = vsel %vm1564_vm9, %v1536_v31, %v1178_v51  ;;  %v1537_v51 = vsel %vm1531_vm8, %v1504_v9, %v1078_v47  ;;  %v4628_v47 = vld [vmem:[#allocation58_spill] sm:$0xff] }
 0x1be   : > { %1089 = vrot.lane.b32.xlu0 %v2396_v12, %s2482_s24  ;;  %v4629_v12 = vld [vmem:[#allocation41_spill] sm:$0xff] }
 0x1bf   : > { %v3942_v28 = vpop.permute.xlu1 %912 }
 0x1c0   : > { %v3944_v11 = vpop.permute.xlu0 %880 }
 0x1c1   : > { %1221 = vrot.lane.b32.xlu1 %v4622_v61, %s2483_s6 }
 0x1c2   : > { %1189 = vrot.lane.b32.xlu0 %v4623_v26, %s2483_s6 }
 0x1c3   : > { %v1212_v39 = vpop.permute.xlu1 %1211 }
 0x1c4   : > { %v1180_v17 = vpop.permute.xlu0 %1179  ;;  %v1586_v46 = vsel %vm1564_vm9, %v1553_v20, %v1212_v39 }
 0x1c5   : > { %924 = vrot.lane.b32.xlu1 %v4622_v61, %s2480_s21  ;;  %v1570_v29 = vsel %vm1564_vm9, %v1537_v51, %v1180_v17  ;;  %v864_v17 = vrot.slane %v3267_v23, 1  ;;  %v4632_v51 = vld [vmem:[#allocation44_spill] sm:$0xff] }
 0x1c6   : > { %892 = vrot.lane.b32.xlu0 %v4623_v26, %s2480_s21 }
 0x1c7   : > { %v1311_v24 = vpop.permute.xlu1 %1310  ;;  %v865_v63 = vsel %vm410_vm0, %v863_v56, %v864_v17 }
 0x1c8   : > { %v1618_v62 = vsel %vm1597_vm10, %v1585_v8, %v1311_v24  ;;  %v1279_v40 = vpop.permute.xlu0 %1278  ;;  %v358_v8 = vld [vmem:[%s3258_s14 + $0x10] sm:$0x3] }
 0x1c9   : > { %v1602_v34 = vsel %vm1597_vm10, %v1569_v45, %v1279_v40  ;;  %1223 = vrot.lane.b32.xlu1 %v4624_v48, %s2483_s6  ;;  %2279 = vmatprep.mubr.msk.f32.mxu1 %vm1642_vm11, %v1618_v62  ;;  %v4630_v45 = vld [vmem:[#allocation16_spill] sm:$0xff]  ;;  %v1488_v40 = vsel %vm1465_vm6, %v3617_v38, %v3942_v28 }
 0x1ca   : > { %1191 = vrot.lane.b32.xlu0 %v4625_v52, %s2483_s6  ;;  %2255 = vmatprep.mubr.msk.f32.mxu0 %vm1642_vm11, %v1602_v34 }
 0x1cb   : > { %v3974_v19 = vpop.permute.xlu1 %914 }
 0x1cc   : > { %v3976_v49 = vpop.permute.xlu0 %882 }
 0x1cd   : > { %1322 = vrot.lane.b32.xlu1 %v4626_v25, %s2484_s29 }
 0x1ce   : > { %1290 = vrot.lane.b32.xlu0 %v4627_v44, %s2484_s29 }
 0x1cf   : > { %v1014_v54 = vpop.permute.xlu1 %1013 }
 0x1d0   : > { %v982_v10 = vpop.permute.xlu0 %981 }
 0x1d1   : > { %926 = vrot.lane.b32.xlu1 %v4624_v48, %s2480_s21  ;;  %v1472_v48 = vsel %vm1465_vm6, %v3529_v5, %v3944_v11 }
 0x1d2   : > { %894 = vrot.lane.b32.xlu0 %v4625_v52, %s2480_s21  ;;  %v1521_v52 = vsel %vm1498_vm7, %v1488_v40, %v1014_v54 }
 0x1d3   : > { %v1313_v35 = vpop.permute.xlu1 %1312 }
 0x1d4   : > { %v1619_v37 = vsel %vm1597_vm10, %v1586_v46, %v1313_v35  ;;  %v1281_v13 = vpop.permute.xlu0 %1280  ;;  %v1489_v35 = vsel %vm1465_vm6, %v3613_v4, %v3974_v19 }
 0x1d5   : > { %v1603_v14 = vsel %vm1597_vm10, %v1570_v29, %v1281_v13  ;;  %1025 = vrot.lane.b32.xlu1 %v4626_v25, %s2481_s22  ;;  %2280 = vmatmul.mubr.msk.f32.gmra.mrb[4].mxu1 %vm1642_vm11, %v1619_v37  ;;  %v964_v25 = vrot.slane %v3273_v43, 2  ;;  %v1473_v37 = vsel %vm1465_vm6, %v3525_v3, %v3976_v49 }
 0x1d6   : > { %993 = vrot.lane.b32.xlu0 %v4627_v44, %s2481_s22  ;;  %2256 = vmatmul.mubr.msk.f32.gmra.mrb[4].mxu0 %vm1642_vm11, %v1603_v14  ;;  %v1505_v44 = vsel %vm1498_vm7, %v1472_v48, %v982_v10  ;;  %v4631_v10 = vld [vmem:[#allocation15_spill] sm:$0xff] }
 0x1d7   : > { %v1016_v36 = vpop.permute.xlu1 %1015 }
 0x1d8   : > { %v984_v60 = vpop.permute.xlu0 %983  ;;  %v1522_v13 = vsel %vm1498_vm7, %v1489_v35, %v1016_v36 }
 0x1d9   : > { %1324 = vrot.lane.b32.xlu1 %v4628_v47, %s2484_s29  ;;  %v1506_v14 = vsel %vm1498_vm7, %v1473_v37, %v984_v60 }
 0x1da   : > { %1292 = vrot.lane.b32.xlu0 %v4629_v12, %s2484_s29 }
 0x1db   : > { %v1112_v61 = vpop.permute.xlu1 %1111 }
 0x1dc   : > { %v1080_v26 = vpop.permute.xlu0 %1079  ;;  %v1554_v42 = vsel %vm1531_vm8, %v1521_v52, %v1112_v61 }
 0x1dd   : > { %1027 = vrot.lane.b32.xlu1 %v4628_v47, %s2481_s22 }
 0x1de   : > { %995 = vrot.lane.b32.xlu0 %v4629_v12, %s2481_s22  ;;  %v967_v12 = vrot.slane %v358_v8, 2 }
 0x1df   : > { %v1114_v39 = vpop.permute.xlu1 %1113 }
 0x1e0   : > { %v1082_v6 = vpop.permute.xlu0 %1081  ;;  %v1555_v47 = vsel %vm1531_vm8, %v1522_v13, %v1114_v39 }
 0x1e1   : > { %1123 = vrot.lane.b32.xlu1 %v3273_v43, %s2482_s24  ;;  %v1539_v61 = vsel %vm1531_vm8, %v1506_v14, %v1082_v6 }
 0x1e2   : > { %1091 = vrot.lane.b32.xlu0 %v3722_v2, %s2482_s24  ;;  %v866_v2 = vrot.slane %v358_v8, 1  ;;  %v360_v8 = vld [vmem:[%s3258_s14 + $0x20] sm:$0xff] }
 0x1e3   : > { %v1214_v16 = vpop.permute.xlu1 %1213 }
 0x1e4   : > { %v1182_v1 = vpop.permute.xlu0 %1181  ;;  %v867_v38 = vsel %vm410_vm0, %v864_v17, %v866_v2  ;;  %v1587_v28 = vsel %vm1564_vm9, %v1554_v42, %v1214_v16  ;;  %v4633_v17 = vld [vmem:[#allocation43_spill] sm:$0xff] }
 0x1e5   : > { %1125 = vrot.lane.b32.xlu1 %v3267_v23, %s2482_s24 }
 0x1e6   : > { %1093 = vrot.lane.b32.xlu0 %v3780_v27, %s2482_s24  ;;  %v965_v27 = vrot.slane %v3267_v23, 2  ;;  %v1538_v23 = vsel %vm1531_vm8, %v1505_v44, %v1080_v26 }
 0x1e7   : > { %v4025_v31 = vpop.permute.xlu1 %916  ;;  %v1571_v11 = vsel %vm1564_vm9, %v1538_v23, %v1182_v1  ;;  %v359_v1 = vld [vmem:[%s3258_s14 + $0x18] sm:$0xff] }
 0x1e8   : > { %v4028_v24 = vpop.permute.xlu0 %884  ;;  %v966_v33 = vsel %vm587_vm1, %v964_v25, %v965_v27  ;;  %v968_v60 = vsel %vm587_vm1, %v965_v27, %v967_v12  ;;  %v1164_v2 = vrot.slane %v359_v1, 1  ;;  %v1265_v42 = vrot.slane %v359_v1, 2 }
 0x1e9   : > { %1225 = vrot.lane.b32.xlu1 %v865_v63, %s2483_s6 }
 0x1ea   : > { %1193 = vrot.lane.b32.xlu0 %v4630_v45, %s2483_s6 }
 0x1eb   : > { %v1216_v62 = vpop.permute.xlu1 %1215 }
 0x1ec   : > { %v1184_v34 = vpop.permute.xlu0 %1183  ;;  %v1588_v4 = vsel %vm1564_vm9, %v1555_v47, %v1216_v62  ;;  %v1165_v62 = vrot.slane %v360_v8, 1 }
 0x1ed   : > { %928 = vrot.lane.b32.xlu1 %v865_v63, %s2480_s21  ;;  %v1572_v26 = vsel %vm1564_vm9, %v1539_v61, %v1184_v34  ;;  %v361_v34 = vld [vmem:[%s3258_s14 + $0x28] sm:$0x3] }
 0x1ee   : > { %896 = vrot.lane.b32.xlu0 %v4630_v45, %s2480_s21  ;;  %v1166_v48 = vsel %vm410_vm0, %v1164_v2, %v1165_v62  ;;  %v1167_v52 = vrot.slane %v361_v34, 1 }
 0x1ef   : > { %v1315_v5 = vpop.permute.xlu1 %1314 }
 0x1f0   : > { %v1620_v54 = vsel %vm1597_vm10, %v1587_v28, %v1315_v5  ;;  %v1283_v57 = vpop.permute.xlu0 %1282  ;;  %v1474_v5 = vsel %vm1465_vm6, %v3541_v58, %v4028_v24 }
 0x1f1   : > { %v1604_v43 = vsel %vm1597_vm10, %v1571_v11, %v1283_v57  ;;  %1227 = vrot.lane.b32.xlu1 %v867_v38, %s2483_s6  ;;  %2282 = vmatprep.mubr.msk.f32.mxu1 %vm1642_vm11, %v1620_v54 }
 0x1f2   : > { %1195 = vrot.lane.b32.xlu0 %v4631_v10, %s2483_s6  ;;  %2258 = vmatprep.mubr.msk.f32.mxu0 %vm1642_vm11, %v1604_v43  ;;  %v1268_v43 = vrot.slane %v361_v34, 2 }
 0x1f3   : > { %v4059_v9 = vpop.permute.xlu1 %918 }
 0x1f4   : > { %v4061_v20 = vpop.permute.xlu0 %886  ;;  %v1491_v37 = vsel %vm1465_vm6, %v3625_v41, %v4059_v9 }
 0x1f5   : > { %1326 = vrot.lane.b32.xlu1 %v966_v33, %s2484_s29 }
 0x1f6   : > { %1294 = vrot.lane.b32.xlu0 %v4632_v51, %s2484_s29 }
 0x1f7   : > { %v1018_v46 = vpop.permute.xlu1 %1017 }
 0x1f8   : > { %v986_v29 = vpop.permute.xlu0 %985 }
 0x1f9   : > { %930 = vrot.lane.b32.xlu1 %v867_v38, %s2480_s21  ;;  %v1266_v38 = vrot.slane %v360_v8, 2  ;;  %v1507_v54 = vsel %vm1498_vm7, %v1474_v5, %v986_v29 }
 0x1fa   : > { %898 = vrot.lane.b32.xlu0 %v4631_v10, %s2480_s21 }
 0x1fb   : > { %v1317_v19 = vpop.permute.xlu1 %1316  ;;  %v1267_v57 = vsel %vm587_vm1, %v1265_v42, %v1266_v38 }
 0x1fc   : > { %v1621_v3 = vsel %vm1597_vm10, %v1588_v4, %v1317_v19  ;;  %v1285_v49 = vpop.permute.xlu0 %1284 }
 0x1fd   : > { %v1605_v36 = vsel %vm1597_vm10, %v1572_v26, %v1285_v49  ;;  %1029 = vrot.lane.b32.xlu1 %v966_v33, %s2481_s22  ;;  %2283 = vmatmul.mubr.msk.f32.gmra.mrb[6].mxu1 %vm1642_vm11, %v1621_v3 }
 0x1fe   : > { %997 = vrot.lane.b32.xlu0 %v4632_v51, %s2481_s22  ;;  %2259 = vmatmul.mubr.msk.f32.gmra.mrb[6].mxu0 %vm1642_vm11, %v1605_v36 }
 0x1ff   : > { %v1020_v39 = vpop.permute.xlu1 %1019 }
 0x200   : > { %v988_v6 = vpop.permute.xlu0 %987  ;;  %v1524_v14 = vsel %vm1498_vm7, %v1491_v37, %v1020_v39 }
 0x201   : > { %1328 = vrot.lane.b32.xlu1 %v968_v60, %s2484_s29 }
 0x202   : > { %1296 = vrot.lane.b32.xlu0 %v4633_v17, %s2484_s29 }
 0x203   : > { %v1116_v56 = vpop.permute.xlu1 %1115 }
 0x204   : > { %v1084_v16 = vpop.permute.xlu0 %1083 }
 0x205   : > { %1031 = vrot.lane.b32.xlu1 %v968_v60, %s2481_s22 }
 0x206   : > { %999 = vrot.lane.b32.xlu0 %v4633_v17, %s2481_s22  ;;  %s2157_s22 = sshll.u32 %s268_s7, 8 }
 0x207   : > { %v1118_v63 = vpop.permute.xlu1 %1117 }
 0x208   : > { %v1086_v45 = vpop.permute.xlu0 %1085  ;;  %v1557_v12 = vsel %vm1531_vm8, %v1524_v14, %v1118_v63 }
 0x209   : > { %1127 = vrot.lane.b32.xlu1 %v359_v1, %s2482_s24 }
 0x20a   : > { %1095 = vrot.lane.b32.xlu0 %v3833_v30, %s2482_s24  ;;  %v1168_v30 = vsel %vm410_vm0, %v1165_v62, %v1167_v52 }
 0x20b   : > { %v1218_v40 = vpop.permute.xlu1 %1217 }
 0x20c   : > { %v1186_v27 = vpop.permute.xlu0 %1185 }
 0x20d   : > { %1129 = vrot.lane.b32.xlu1 %v360_v8, %s2482_s24 }
 0x20e   : > { %1097 = vrot.lane.b32.xlu0 %v3881_v22, %s2482_s24  ;;  %v1490_v22 = vsel %vm1465_vm6, %v3629_v0, %v4025_v31  ;;  %v1540_v0 = vsel %vm1531_vm8, %v1507_v54, %v1084_v16  ;;  %s4201_s24 = scalar_lea.vmem [#allocation2], %s2157_s22 }
 0x20f   : > { %v921_v25 = vpop.permute.xlu1 %920  ;;  %v1523_v11 = vsel %vm1498_vm7, %v1490_v22, %v1018_v46  ;;  %v1573_v58 = vsel %vm1564_vm9, %v1540_v0, %v1186_v27  ;;  %s2049_s5 = sshll.u32 %s4201_s24, 4  ;;  %s4335_s5 = int_to_ptr.vmem [resolvable:$true] %s2049_s5 }
 0x210   : > { %v4105_v44 = vpop.permute.xlu0 %888  ;;  %v1492_v1 = vsel %vm1465_vm6, %v3641_v15, %v921_v25  ;;  %s2397_s11 = scalar_lea.vmem %s4335_s5, 4096  ;;  %p2404_p1 = scmp.lt.s32.totalorder %s4335_s5, %s2402_s13 }
 0x211   : > { %1229 = vrot.lane.b32.xlu1 %v1166_v48, %s2483_s6  ;;  %v1476_v8 = vsel %vm1465_vm6, %v3553_v55, %v4105_v44  ;;  %p2398_p12 = scmp.ne.s32.totalorder %s4335_s5, %s2397_s11  ;;  %p2405_p2 = scmp.lt.s32.totalorder %s2403_s26, %s2397_s11 }
 0x212   : > { %1197 = vrot.lane.b32.xlu0 %v2798_v50, %s2483_s6  ;;  %v1556_v50 = vsel %vm1531_vm8, %v1523_v11, %v1116_v56 }
 0x213   : > { %v1220_v23 = vpop.permute.xlu1 %1219  ;;  %v1589_v31 = vsel %vm1564_vm9, %v1556_v50, %v1218_v40  ;;  %p2399_p13 = pnand %p2398_p12, %p2552_p4  ;;  %p2406_p3 = por %p2405_p2, %p2404_p1 }
 0x214   : > { %v1188_v28 = vpop.permute.xlu0 %1187 }
 0x215   : > { %1231 = vrot.lane.b32.xlu1 %v1168_v30, %s2483_s6  ;;  %p2400_p0 = pneg %p2399_p13 }
 0x216   : > { %1199 = vrot.lane.b32.xlu0 %v4562_v21, %s2483_s6  ;;  %v1269_v21 = vsel %vm587_vm1, %v1266_v38, %v1268_v43 }
 0x217   : > { %v1319_v10 = vpop.permute.xlu1 %1318  ;;  %p2407_p5 = pnand %p2406_p3, %p2400_p0 }
 0x218   : > { %v1622_v24 = vsel %vm1597_vm10, %v1589_v31, %v1319_v10  ;;  %v1287_v33 = vpop.permute.xlu0 %1286 }
 0x219   : > { %v1606_v51 = vsel %vm1597_vm10, %v1573_v58, %v1287_v33  ;;  %1330 = vrot.lane.b32.xlu1 %v1267_v57, %s2484_s29  ;;  %2285 = vmatprep.mubr.msk.f32.mxu1 %vm1642_vm11, %v1622_v24  ;;  %v4195_v24 = vld [vmem:[%s4392_s3] ss:$0 sm:$0xff] }
 0x21a   : > { %1298 = vrot.lane.b32.xlu0 %v3045_v18, %s2484_s29  ;;  %2261 = vmatprep.mubr.msk.f32.mxu0 %vm1642_vm11, %v1606_v51  ;;  %v1475_v18 = vsel %vm1465_vm6, %v3537_v59, %v4061_v20 }
 0x21b   : > { %v923_v46 = vpop.permute.xlu1 %922  ;;  %v1508_v47 = vsel %vm1498_vm7, %v1475_v18, %v988_v6 }
 0x21c   : > { %v891_v35 = vpop.permute.xlu0 %890  ;;  %v1541_v61 = vsel %vm1531_vm8, %v1508_v47, %v1086_v45  ;;  %v1493_v38 = vsel %vm1465_vm6, %v3637_v32, %v923_v46 }
 0x21d   : > { %1332 = vrot.lane.b32.xlu1 %v1269_v21, %s2484_s29  ;;  %v1574_v19 = vsel %vm1564_vm9, %v1541_v61, %v1188_v28 }
 0x21e   : > { %1300 = vrot.lane.b32.xlu0 %v3040_v7, %s2484_s29  ;;  %v1590_v7 = vsel %vm1564_vm9, %v1557_v12, %v1220_v23  ;;  %v1477_v23 = vsel %vm1465_vm6, %v3549_v53, %v891_v35 }
 0x21f   : > { %v1022_v29 = vpop.permute.xlu1 %1021 }
 0x220   : > { %v990_v13 = vpop.permute.xlu0 %989  ;;  %v1525_v45 = vsel %vm1498_vm7, %v1492_v1, %v1022_v29 }
 0x221   : > { %v1509_v2 = vsel %vm1498_vm7, %v1476_v8, %v990_v13 }
 0x223   : > { %v1321_v4 = vpop.permute.xlu1 %1320 }
 0x224   : > { %v1623_v41 = vsel %vm1597_vm10, %v1590_v7, %v1321_v4  ;;  %v1289_v9 = vpop.permute.xlu0 %1288 }
 0x225   : > { %v1607_v26 = vsel %vm1597_vm10, %v1574_v19, %v1289_v9  ;;  %2286 = vmatmul.mubr.msk.f32.gmra.mrb[8].mxu1 %vm1642_vm11, %v1623_v41 }
 0x226   : > { %2262 = vmatmul.mubr.msk.f32.gmra.mrb[8].mxu0 %vm1642_vm11, %v1607_v26 }
 0x227   : > { %v1024_v59 = vpop.permute.xlu1 %1023 }
 0x228   : > { %v992_v20 = vpop.permute.xlu0 %991  ;;  %v1526_v22 = vsel %vm1498_vm7, %v1493_v38, %v1024_v59  ;;  %v4634_v59 = vld [vmem:[#allocation26_spill] sm:$0xff] }
 0x229   : > { %v1510_v28 = vsel %vm1498_vm7, %v1477_v23, %v992_v20 }
 0x22b   : > { %v1120_v3 = vpop.permute.xlu1 %1119 }
 0x22c   : > { %v1088_v49 = vpop.permute.xlu0 %1087  ;;  %v1558_v62 = vsel %vm1531_vm8, %v1525_v45, %v1120_v3 }
 0x22d   : > { %v1542_v40 = vsel %vm1531_vm8, %v1509_v2, %v1088_v49  ;;  %v4635_v49 = vld [vmem:[#allocation17_spill] sm:$0xff] }
 0x22f   : > { %v1122_v36 = vpop.permute.xlu1 %1121 }
 0x230   : > { %v1090_v60 = vpop.permute.xlu0 %1089  ;;  %v1559_v5 = vsel %vm1531_vm8, %v1526_v22, %v1122_v36 }
 0x231   : > { %v1543_v11 = vsel %vm1531_vm8, %v1510_v28, %v1090_v60 }
 0x233   : > { %v1222_v39 = vpop.permute.xlu1 %1221 }
 0x234   : > { %v1190_v6 = vpop.permute.xlu0 %1189  ;;  %v1591_v34 = vsel %vm1564_vm9, %v1558_v62, %v1222_v39 }
 0x235   : > { %v1575_v48 = vsel %vm1564_vm9, %v1542_v40, %v1190_v6 }
 0x237   : > { %v4154_v17 = vpop.permute.xlu1 %924 }
 0x238   : > { %v4156_v56 = vpop.permute.xlu0 %892  ;;  %v1494_v20 = vsel %vm1465_vm6, %v4634_v59, %v4154_v17 }
 0x239   : > { %v1478_v36 = vsel %vm1465_vm6, %v4635_v49, %v4156_v56 }
 0x23b   : > { %v1224_v16 = vpop.permute.xlu1 %1223 }
 0x23c   : > { %v1192_v63 = vpop.permute.xlu0 %1191  ;;  %v1592_v54 = vsel %vm1564_vm9, %v1559_v5, %v1224_v16 }
 0x23d   : > { %v1576_v57 = vsel %vm1564_vm9, %v1543_v11, %v1192_v63 }
 0x23f   : > { %v1323_v27 = vpop.permute.xlu1 %1322 }
 0x240   : > { %v1624_v15 = vsel %vm1597_vm10, %v1591_v34, %v1323_v27  ;;  %v1291_v52 = vpop.permute.xlu0 %1290  ;;  %v4636_v34 = vld [vmem:[#allocation64_spill] sm:$0xff] }
 0x241   : > { %v1608_v25 = vsel %vm1597_vm10, %v1575_v48, %v1291_v52  ;;  %2288 = vmatprep.mubr.msk.f32.mxu1 %vm1642_vm11, %v1624_v15  ;;  %v4637_v15 = vld [vmem:[#allocation6_spill] sm:$0xff] }
 0x242   : > { %2264 = vmatprep.mubr.msk.f32.mxu0 %vm1642_vm11, %v1608_v25 }
 0x243   : > { %v4173_v55 = vpop.permute.xlu1 %926 }
 0x244   : > { %v4175_v44 = vpop.permute.xlu0 %894  ;;  %v1495_v27 = vsel %vm1465_vm6, %v4636_v34, %v4173_v55 }
 0x245   : > { %v1479_v52 = vsel %vm1465_vm6, %v4637_v15, %v4175_v44 }
 0x247   : > { %v1026_v42 = vpop.permute.xlu1 %1025 }
 0x248   : > { %v994_v30 = vpop.permute.xlu0 %993  ;;  %v1527_v60 = vsel %vm1498_vm7, %v1494_v20, %v1026_v42 }
 0x249   : > { %v1511_v39 = vsel %vm1498_vm7, %v1478_v36, %v994_v30  ;;  %v4640_v36 = vld [vmem:[#allocation65_spill] sm:$0xff] }
 0x24b   : > { %v1325_v50 = vpop.permute.xlu1 %1324 }
 0x24c   : > { %v1625_v32 = vsel %vm1597_vm10, %v1592_v54, %v1325_v50  ;;  %v1293_v43 = vpop.permute.xlu0 %1292 }
 0x24d   : > { %v1609_v53 = vsel %vm1597_vm10, %v1576_v57, %v1293_v43  ;;  %2289 = vmatmul.mubr.msk.f32.gmra.mrb[10].mxu1 %vm1642_vm11, %v1625_v32 }
 0x24e   : > { %2265 = vmatmul.mubr.msk.f32.gmra.mrb[10].mxu0 %vm1642_vm11, %v1609_v53 }
 0x24f   : > { %v1028_v0 = vpop.permute.xlu1 %1027 }
 0x250   : > { %v996_v31 = vpop.permute.xlu0 %995  ;;  %v1528_v25 = vsel %vm1498_vm7, %v1495_v27, %v1028_v0 }
 0x251   : > { %v1512_v42 = vsel %vm1498_vm7, %v1479_v52, %v996_v31 }
 0x253   : > { %v1124_v10 = vpop.permute.xlu1 %1123 }
 0x254   : > { %v1092_v58 = vpop.permute.xlu0 %1091  ;;  %v1560_v6 = vsel %vm1531_vm8, %v1527_v60, %v1124_v10 }
 0x255   : > { %v1544_v16 = vsel %vm1531_vm8, %v1511_v39, %v1092_v58 }
 0x257   : > { %v1126_v33 = vpop.permute.xlu1 %1125 }
 0x258   : > { %v1094_v51 = vpop.permute.xlu0 %1093  ;;  %v2251_v21 = vpop.f32.mrb[0].mxu0  ;;  %v1561_v38 = vsel %vm1531_vm8, %v1528_v25, %v1126_v33 }
 0x259   : > { %v1815_v46 = vadd.f32 %v2251_v21, %v4195_v24  ;;  %v1809_v35 = vpop.f32.mrb[1].mxu0  ;;  %v1545_v30 = vsel %vm1531_vm8, %v1512_v42, %v1094_v51 }
 0x25a   : > { %v1810_v29 = vadd.f32 %v4195_v24, %v1809_v35 }
 0x25b   : > { %v1969_v37 = vmax.f32 %v1815_v46, 0.0  ;;  %v1226_v13 = vpop.permute.xlu1 %1225 }
 0x25c   : > { %v1968_v18 = vmax.f32 %v1810_v29, 0.0  ;;  %v1194_v14 = vpop.permute.xlu0 %1193  ;;  %v1593_v1 = vsel %vm1564_vm9, %v1560_v6, %v1226_v13 }
 0x25d   : > { %2001 = vst [vmem:[%s4201_s24 + $0x8] sm:$0xff] %v1969_v37  ;;  %v2275_v47 = vpop.f32.mrb[0].mxu1  ;;  %v1577_v8 = vsel %vm1564_vm9, %v1544_v16, %v1194_v14 }
 0x25e   : > { %2000 = vst [vmem:[%s4201_s24] sm:$0xff] %v1968_v18  ;;  %v1895_v12 = vadd.f32 %v2275_v47, %v4195_v24  ;;  %v1889_v61 = vpop.f32.mrb[1].mxu1  ;;  %v4638_v47 = vld [vmem:[#allocation27_spill] sm:$0xff] }
 0x25f   : > { %v1890_v7 = vadd.f32 %v4195_v24, %v1889_v61  ;;  %v4207_v4 = vpop.permute.xlu1 %928 }
 0x260   : > { %v1985_v19 = vmax.f32 %v1895_v12, 0.0  ;;  %v4209_v41 = vpop.permute.xlu0 %896  ;;  %v1496_v12 = vsel %vm1465_vm6, %v4638_v47, %v4207_v4 }
 0x261   : > { %v1984_v9 = vmax.f32 %v1890_v7, 0.0  ;;  %v4639_v7 = vld [vmem:[#allocation18_spill] sm:$0xff] }
 0x262   : > { %2017 = vst [vmem:[%s4201_s24 + $0x88] sm:$0xff] %v1985_v19  ;;  %v1480_v19 = vsel %vm1465_vm6, %v4639_v7, %v4209_v41  ;;  %v4641_v41 = vld [vmem:[#allocation19_spill] sm:$0xff] }
 0x263   : > { %2016 = vst [vmem:[%s4201_s24 + $0x80] sm:$0xff] %v1984_v9  ;;  %v1228_v26 = vpop.permute.xlu1 %1227 }
 0x264   : > { %v1196_v3 = vpop.permute.xlu0 %1195  ;;  %v1594_v23 = vsel %vm1564_vm9, %v1561_v38, %v1228_v26 }
 0x265   : > { %v1578_v28 = vsel %vm1564_vm9, %v1545_v30, %v1196_v3 }
 0x267   : > { %v1327_v63 = vpop.permute.xlu1 %1326 }
 0x268   : > { %v1626_v17 = vsel %vm1597_vm10, %v1593_v1, %v1327_v63  ;;  %v1295_v45 = vpop.permute.xlu0 %1294 }
 0x269   : > { %v1610_v2 = vsel %vm1597_vm10, %v1577_v8, %v1295_v45  ;;  %2291 = vmatprep.mubr.msk.f32.mxu1 %vm1642_vm11, %v1626_v17 }
 0x26a   : > { %2267 = vmatprep.mubr.msk.f32.mxu0 %vm1642_vm11, %v1610_v2 }
 0x26b   : > { %v931_v56 = vpop.permute.xlu1 %930 }
 0x26c   : > { %v899_v62 = vpop.permute.xlu0 %898  ;;  %v1497_v60 = vsel %vm1465_vm6, %v4640_v36, %v931_v56 }
 0x26d   : > { %v1481_v16 = vsel %vm1465_vm6, %v4641_v41, %v899_v62 }
 0x26f   : > { %v1030_v40 = vpop.permute.xlu1 %1029 }
 0x270   : > { %v998_v48 = vpop.permute.xlu0 %997  ;;  %v1529_v9 = vsel %vm1498_vm7, %v1496_v12, %v1030_v40 }
 0x271   : > { %v1513_v26 = vsel %vm1498_vm7, %v1480_v19, %v998_v48 }
 0x273   : > { %v1329_v22 = vpop.permute.xlu1 %1328 }
 0x274   : > { %v1627_v55 = vsel %vm1597_vm10, %v1594_v23, %v1329_v22  ;;  %v1297_v5 = vpop.permute.xlu0 %1296 }
 0x275   : > { %v1611_v11 = vsel %vm1597_vm10, %v1578_v28, %v1297_v5  ;;  %2292 = vmatmul.mubr.msk.f32.gmra.mrb[12].mxu1 %vm1642_vm11, %v1627_v55 }
 0x276   : > { %2268 = vmatmul.mubr.msk.f32.gmra.mrb[12].mxu0 %vm1642_vm11, %v1611_v11 }
 0x277   : > { %v1032_v44 = vpop.permute.xlu1 %1031 }
 0x278   : > { %v1000_v54 = vpop.permute.xlu0 %999  ;;  %v1530_v1 = vsel %vm1498_vm7, %v1497_v60, %v1032_v44 }
 0x279   : > { %v1514_v8 = vsel %vm1498_vm7, %v1481_v16, %v1000_v54 }
 0x27b   : > { %v1128_v50 = vpop.permute.xlu1 %1127 }
 0x27c   : > { %v1096_v57 = vpop.permute.xlu0 %1095  ;;  %v1562_v59 = vsel %vm1531_vm8, %v1529_v9, %v1128_v50 }
 0x27d   : > { %v1546_v20 = vsel %vm1531_vm8, %v1513_v26, %v1096_v57 }
 0x27f   : > { %v1130_v32 = vpop.permute.xlu1 %1129 }
 0x280   : > { %v1098_v43 = vpop.permute.xlu0 %1097  ;;  %v2278_v53 = vpop.f32.mrb[2].mxu1  ;;  %v1563_v17 = vsel %vm1531_vm8, %v1530_v1, %v1130_v32 }
 0x281   : > { %v2254_v0 = vpop.f32.mrb[2].mxu0  ;;  %v1905_v31 = vadd.f32 %v2278_v53, %v4195_v24  ;;  %v1899_v10 = vpop.f32.mrb[3].mxu1  ;;  %v1547_v45 = vsel %vm1531_vm8, %v1514_v8, %v1098_v43 }
 0x282   : > { %v1825_v58 = vadd.f32 %v2254_v0, %v4195_v24  ;;  %v1819_v33 = vpop.f32.mrb[3].mxu0  ;;  %v1900_v51 = vadd.f32 %v4195_v24, %v1899_v10 }
 0x283   : > { %v1987_v21 = vmax.f32 %v1905_v31, 0.0  ;;  %v1820_v46 = vadd.f32 %v4195_v24, %v1819_v33  ;;  %v1230_v35 = vpop.permute.xlu1 %1229 }
 0x284   : > { %v1971_v29 = vmax.f32 %v1825_v58, 0.0  ;;  %v1986_v37 = vmax.f32 %v1900_v51, 0.0  ;;  %v1198_v13 = vpop.permute.xlu0 %1197  ;;  %v1595_v3 = vsel %vm1564_vm9, %v1562_v59, %v1230_v35 }
 0x285   : > { %2019 = vst [vmem:[%s4201_s24 + $0x98] sm:$0xff] %v1987_v21  ;;  %v1970_v18 = vmax.f32 %v1820_v46, 0.0  ;;  %v1579_v4 = vsel %vm1564_vm9, %v1546_v20, %v1198_v13 }
 0x286   : > { %2003 = vst [vmem:[%s4201_s24 + $0x18] sm:$0xff] %v1971_v29  ;;  %2018 = vst [vmem:[%s4201_s24 + $0x90] sm:$0xff] %v1986_v37 }
 0x287   : > { %2002 = vst [vmem:[%s4201_s24 + $0x10] sm:$0xff] %v1970_v18  ;;  %v1232_v14 = vpop.permute.xlu1 %1231 }
 0x288   : > { %v1200_v61 = vpop.permute.xlu0 %1199  ;;  %v1596_v2 = vsel %vm1564_vm9, %v1563_v17, %v1232_v14 }
 0x289   : > { %v1580_v40 = vsel %vm1564_vm9, %v1547_v45, %v1200_v61 }
 0x28b   : > { %v1331_v49 = vpop.permute.xlu1 %1330 }
 0x28c   : > { %v1628_v39 = vsel %vm1597_vm10, %v1595_v3, %v1331_v49  ;;  %v1299_v6 = vpop.permute.xlu0 %1298 }
 0x28d   : > { %v1612_v63 = vsel %vm1597_vm10, %v1579_v4, %v1299_v6  ;;  %2294 = vmatprep.mubr.msk.f32.mxu1 %vm1642_vm11, %v1628_v39 }
 0x28e   : > { %2270 = vmatprep.mubr.msk.f32.mxu0 %vm1642_vm11, %v1612_v63 }
 0x28f   : > { %v1333_v56 = vpop.permute.xlu1 %1332 }
 0x290   : > { %v1629_v62 = vsel %vm1597_vm10, %v1596_v2, %v1333_v56  ;;  %v1301_v34 = vpop.permute.xlu0 %1300 }
 0x291   : > { %v1613_v27 = vsel %vm1597_vm10, %v1580_v40, %v1301_v34  ;;  %2295 = vmatmul.mubr.msk.f32.gmra.mrb[14].mxu1 %vm1642_vm11, %v1629_v62 }
 0x292   : > { %2271 = vmatmul.mubr.msk.f32.gmra.mrb[14].mxu0 %vm1642_vm11, %v1613_v27 }
 0x2a8   : > { %v2281_v48 = vpop.f32.mrb[4].mxu1 }
 0x2a9   : > { %v2257_v15 = vpop.f32.mrb[4].mxu0  ;;  %v1915_v52 = vadd.f32 %v2281_v48, %v4195_v24  ;;  %v1909_v25 = vpop.f32.mrb[5].mxu1 }
 0x2aa   : > { %v1835_v42 = vadd.f32 %v2257_v15, %v4195_v24  ;;  %v1829_v38 = vpop.f32.mrb[5].mxu0  ;;  %v1910_v30 = vadd.f32 %v4195_v24, %v1909_v25 }
 0x2ab   : > { %v1989_v23 = vmax.f32 %v1915_v52, 0.0  ;;  %v1830_v22 = vadd.f32 %v4195_v24, %v1829_v38 }
 0x2ac   : > { %v1973_v28 = vmax.f32 %v1835_v42, 0.0  ;;  %v1988_v55 = vmax.f32 %v1910_v30, 0.0 }
 0x2ad   : > { %2021 = vst [vmem:[%s4201_s24 + $0xa8] sm:$0xff] %v1989_v23  ;;  %v1972_v5 = vmax.f32 %v1830_v22, 0.0 }
 0x2ae   : > { %2005 = vst [vmem:[%s4201_s24 + $0x28] sm:$0xff] %v1973_v28  ;;  %2020 = vst [vmem:[%s4201_s24 + $0xa0] sm:$0xff] %v1988_v55 }
 0x2af   : > { %2004 = vst [vmem:[%s4201_s24 + $0x20] sm:$0xff] %v1972_v5 }
 0x2d0   : > { %v2284_v11 = vpop.f32.mrb[6].mxu1 }
 0x2d1   : > { %v2260_v44 = vpop.f32.mrb[6].mxu0  ;;  %v1925_v54 = vadd.f32 %v2284_v11, %v4195_v24  ;;  %v1919_v50 = vpop.f32.mrb[7].mxu1 }
 0x2d2   : > { %v1845_v57 = vadd.f32 %v2260_v44, %v4195_v24  ;;  %v1839_v32 = vpop.f32.mrb[7].mxu0  ;;  %v1920_v43 = vadd.f32 %v4195_v24, %v1919_v50 }
 0x2d3   : > { %v1991_v53 = vmax.f32 %v1925_v54, 0.0  ;;  %v1840_v0 = vadd.f32 %v4195_v24, %v1839_v32 }
 0x2d4   : > { %v1975_v31 = vmax.f32 %v1845_v57, 0.0  ;;  %v1990_v10 = vmax.f32 %v1920_v43, 0.0 }
 0x2d5   : > { %2023 = vst [vmem:[%s4201_s24 + $0xb8] sm:$0xff] %v1991_v53  ;;  %v1974_v58 = vmax.f32 %v1840_v0, 0.0 }
 0x2d6   : > { %2007 = vst [vmem:[%s4201_s24 + $0x38] sm:$0xff] %v1975_v31  ;;  %2022 = vst [vmem:[%s4201_s24 + $0xb0] sm:$0xff] %v1990_v10 }
 0x2d7   : > { %2006 = vst [vmem:[%s4201_s24 + $0x30] sm:$0xff] %v1974_v58 }
 0x2f8   : > { %v2287_v33 = vpop.f32.mrb[8].mxu1 }
 0x2f9   : > { %v2263_v51 = vpop.f32.mrb[8].mxu0  ;;  %v1935_v21 = vadd.f32 %v2287_v33, %v4195_v24  ;;  %v1929_v46 = vpop.f32.mrb[9].mxu1 }
 0x2fa   : > { %v1855_v35 = vadd.f32 %v2263_v51, %v4195_v24  ;;  %v1849_v29 = vpop.f32.mrb[9].mxu0  ;;  %v1930_v37 = vadd.f32 %v4195_v24, %v1929_v46 }
 0x2fb   : > { %v1993_v13 = vmax.f32 %v1935_v21, 0.0  ;;  %v1850_v18 = vadd.f32 %v4195_v24, %v1849_v29 }
 0x2fc   : > { %v1977_v14 = vmax.f32 %v1855_v35, 0.0  ;;  %v1992_v47 = vmax.f32 %v1930_v37, 0.0 }
 0x2fd   : > { %2025 = vst [vmem:[%s4201_s24 + $0xc8] sm:$0xff] %v1993_v13  ;;  %v1976_v12 = vmax.f32 %v1850_v18, 0.0 }
 0x2fe   : > { %2009 = vst [vmem:[%s4201_s24 + $0x48] sm:$0xff] %v1977_v14  ;;  %2024 = vst [vmem:[%s4201_s24 + $0xc0] sm:$0xff] %v1992_v47 }
 0x2ff   : > { %2008 = vst [vmem:[%s4201_s24 + $0x40] sm:$0xff] %v1976_v12 }
 0x320   : > { %v2290_v61 = vpop.f32.mrb[10].mxu1 }
 0x321   : > { %v2266_v7 = vpop.f32.mrb[10].mxu0  ;;  %v1945_v19 = vadd.f32 %v2290_v61, %v4195_v24  ;;  %v1939_v9 = vpop.f32.mrb[11].mxu1 }
 0x322   : > { %v1865_v26 = vadd.f32 %v2266_v7, %v4195_v24  ;;  %v1859_v59 = vpop.f32.mrb[11].mxu0  ;;  %v1940_v20 = vadd.f32 %v4195_v24, %v1939_v9 }
 0x323   : > { %v1995_v3 = vmax.f32 %v1945_v19, 0.0  ;;  %v1860_v49 = vadd.f32 %v4195_v24, %v1859_v59 }
 0x324   : > { %v1979_v36 = vmax.f32 %v1865_v26, 0.0  ;;  %v1994_v60 = vmax.f32 %v1940_v20, 0.0 }
 0x325   : > { %2027 = vst [vmem:[%s4201_s24 + $0xd8] sm:$0xff] %v1995_v3  ;;  %v1978_v4 = vmax.f32 %v1860_v49, 0.0 }
 0x326   : > { %2011 = vst [vmem:[%s4201_s24 + $0x58] sm:$0xff] %v1979_v36  ;;  %2026 = vst [vmem:[%s4201_s24 + $0xd0] sm:$0xff] %v1994_v60 }
 0x327   : > { %2010 = vst [vmem:[%s4201_s24 + $0x50] sm:$0xff] %v1978_v4 }
 0x348   : > { %v2293_v39 = vpop.f32.mrb[12].mxu1 }
 0x349   : > { %v2269_v6 = vpop.f32.mrb[12].mxu0  ;;  %v1955_v41 = vadd.f32 %v2293_v39, %v4195_v24  ;;  %v1949_v16 = vpop.f32.mrb[13].mxu1 }
 0x34a   : > { %v1875_v1 = vadd.f32 %v2269_v6, %v4195_v24  ;;  %v1869_v63 = vpop.f32.mrb[13].mxu0  ;;  %v1950_v8 = vadd.f32 %v4195_v24, %v1949_v16 }
 0x34b   : > { %v1997_v17 = vmax.f32 %v1955_v41, 0.0  ;;  %v1870_v45 = vadd.f32 %v4195_v24, %v1869_v63 }
 0x34c   : > { %v1981_v2 = vmax.f32 %v1875_v1, 0.0  ;;  %v1996_v56 = vmax.f32 %v1950_v8, 0.0 }
 0x34d   : > { %2029 = vst [vmem:[%s4201_s24 + $0xe8] sm:$0xff] %v1997_v17  ;;  %v1980_v40 = vmax.f32 %v1870_v45, 0.0 }
 0x34e   : > { %2013 = vst [vmem:[%s4201_s24 + $0x68] sm:$0xff] %v1981_v2  ;;  %2028 = vst [vmem:[%s4201_s24 + $0xe0] sm:$0xff] %v1996_v56 }
 0x34f   : > { %2012 = vst [vmem:[%s4201_s24 + $0x60] sm:$0xff] %v1980_v40 }
 0x364   : > { %v2296_v62 = vpop.f32.mrb[14].mxu1 }
 0x365   : > { %v2272_v34 = vpop.f32.mrb[14].mxu0  ;;  %v1965_v27 = vadd.f32 %v2296_v62, %v4195_v24  ;;  %v1959_v48 = vpop.f32.mrb[15].mxu1 }
 0x366   : > { %v1885_v15 = vadd.f32 %v2272_v34, %v4195_v24  ;;  %v1879_v52 = vpop.f32.mrb[15].mxu0  ;;  %v1960_v25 = vadd.f32 %v4195_v24, %v1959_v48 }
 0x367   : > { %v1999_v42 = vmax.f32 %v1965_v27, 0.0  ;;  %v1880_v38 = vadd.f32 %v4195_v24, %v1879_v52 }
 0x368   : > { %v1983_v30 = vmax.f32 %v1885_v15, 0.0  ;;  %v1998_v23 = vmax.f32 %v1960_v25, 0.0 }
 0x369   : > { %2031 = vst [vmem:[%s4201_s24 + $0xf8] sm:$0xff] %v1999_v42  ;;  %v1982_v22 = vmax.f32 %v1880_v38, 0.0 }
 0x36a   : > { %2015 = vst [vmem:[%s4201_s24 + $0x78] sm:$0xff] %v1983_v30  ;;  %2030 = vst [vmem:[%s4201_s24 + $0xf0] sm:$0xff] %v1998_v23 }
 0x36b   : > { %2014 = vst [vmem:[%s4201_s24 + $0x70] sm:$0xff] %v1982_v22 }
 0x36c   : > { %2410 = shalt.err (!%p2407_p5)
}
 0x36d   : > { %s2411_s29 = scalar_lea.hbm %s4332_s10, 4096  ;;  %s2415_s21 = scalar_lea.hbm %s4393_s4, 8192 }
 0x36e   : > { %p2412_p6 = scmp.ne.s32.totalorder %s4332_s10, %s2411_s29  ;;  %p2416_p10 = scmp.lt.u32.totalorder %s4332_s10, %s4393_s4 }
 0x36f   : > { %p2417_p11 = scmp.lt.u32.totalorder %s2415_s21, %s2411_s29  ;;  %p2419_p13 = scmp.lt.u32.totalorder %s2411_s29, %s4332_s10 }
 0x370   : > { %p2413_p7 = pnand %p2412_p6, %p2552_p4 }
 0x371   : > { %p2418_p12 = por %p2417_p11, %p2416_p10 }
 0x372   : > { %p2414_p9 = pneg %p2413_p7 }
 0x373   : > { %p2420_p0 = por %p2419_p13, %p2418_p12 }
 0x375   : > { %p2421_p1 = pnand %p2420_p0, %p2414_p9 }
 0x377   : > { %2424 = shalt.err (!%p2421_p1)
}
 0x378   : > { %s2486_s30 = smov 128  }
 0x379   : > { %2313 = dma.vmem_to_hbm [thread:$0]  (%p2552_p4), %s4335_s5, 4096, %s4332_s10, %s4342_s18, %s2486_s30, %s2486_s30, %s2478_s9  }
 0x37a PF: > { %p2320_p2 = scmp.ge.s32.totalorder %s2475_s20, 2  ;;  %s2064_s6 = sand.u32 1, %s2455_s15  }
 0x37b   : > { %s2065_s8 = scalar_lea.sflag [#allocation3], %s2064_s6 }
 0x37c   : > { %p2316_p3 = pnand %p2320_p2, %p2559_p8 }
 0x37e   : > { %2450 = dma.done.wait (!%p2316_p3), %s2065_s8, 4096  }
 0x37f   : > { %2452 = vsyncadd (!%p2316_p3), %s2065_s8, 4294963200  ;;  %s17_s20 = sadd.s32 1, %s2475_s20   ;;  %s4642_s15 = smov %s2459_s16 }
 0x380   : > { %p14_p5 = scmp.ge.s32.totalorder %s17_s20, 4   ;;  %s4643_s16 = smov %s2463_s17 }
 0x381   : > { %s4644_s17 = smov %s2565_s28  ;;  %s4645_s18 = smov %s2471_s19 }
 0x382   : > { %s4646_s19 = smov %s4648_s23  ;;  %16 = sbr.rel (!%p14_p5) target bundleno = 4 (0x4), region = 74 }
 0x389   :  { %2070 = vsyncpa [#allocation3], 1 }
 0x38a   :  { %2072 = vsyncpa [#allocation3 + $0x1], 1 }

</bundles_post_ra>
